<compile_context>
chip_gen: v7x
topology: tpu7x:2x2x1
jax: 0.10.0
libtpu: 0.0.40
codegen_flags: <defaults>
</compile_context>

<pallas_src>
import functools

import jax
import jax.numpy as jnp
from jax.experimental import pallas as pl
from jax.experimental.pallas import tpu as pltpu

LANE = 128
SUBLANE = 8
MAX_TB = 512                    # v6e (128 MiB VMEM) can raise this to 1024
VMEM_BUDGET_BYTES = 48 << 20    # conservative vs. v7x 64 MiB physical per-TC

_HAS_BUFFERED = hasattr(pl, "Buffered")


def _ru(n, m):
    return ((n + m - 1) // m) * m


def _cdiv(a, b):
    return -(-a // b)


def _pad2d(a, rows, cols):
    return jnp.pad(a, ((0, rows - a.shape[0]), (0, cols - a.shape[1])))


# ---------------------------------------------------------------------------
# Fused Pallas kernel: entire VAE forward in one call.
# ---------------------------------------------------------------------------
def _vae_fused_kernel(*refs, n_enc, n_dec, dz_pad, dx_pad):
    it = iter(refs)
    x_ref = next(it)
    enc = [(next(it), next(it)) for _ in range(n_enc)]
    enc_hw, enc_hb = next(it), next(it)
    eps_z_ref = next(it)
    dec = [(next(it), next(it)) for _ in range(n_dec)]
    dec_hw, dec_hb = next(it), next(it)
    eps_x_ref = next(it)
    mu_z_ref, sig_z_ref, z_ref, mu_x_ref, sig_x_ref, xs_ref = list(it)

    # ---- encoder hidden layers (Linear + ReLU); activations stay in VMEM ----
    h = x_ref[...].astype(jnp.bfloat16)
    for w_ref, b_ref in enc:
        y = jnp.dot(h, w_ref[...], preferred_element_type=jnp.float32) + b_ref[...]
        h = jnp.maximum(y, 0.0).astype(jnp.bfloat16)

    # ---- encoder gaussian head: one MXU dot, 128-lane-aligned static split ----
    q = jnp.dot(h, enc_hw[...], preferred_element_type=jnp.float32) + enc_hb[...]
    mu_z = q[:, :dz_pad]
    sigma_z = jnp.exp(q[:, dz_pad:])          # EUP, f32
    z = eps_z_ref[...] * sigma_z + mu_z       # VPU FMA, f32
    mu_z_ref[...] = mu_z
    sig_z_ref[...] = sigma_z
    z_ref[...] = z

    # ---- decoder hidden layers ----
    h = z.astype(jnp.bfloat16)
    for w_ref, b_ref in dec:
        y = jnp.dot(h, w_ref[...], preferred_element_type=jnp.float32) + b_ref[...]
        h = jnp.maximum(y, 0.0).astype(jnp.bfloat16)

    # ---- decoder gaussian head (output_activation = Identity) ----
    p = jnp.dot(h, dec_hw[...], preferred_element_type=jnp.float32) + dec_hb[...]
    mu_x = p[:, :dx_pad]
    sigma_x = jnp.exp(p[:, dx_pad:])
    xs = eps_x_ref[...] * sigma_x + mu_x
    mu_x_ref[...] = mu_x
    sig_x_ref[...] = sigma_x
    xs_ref[...] = xs


# ---------------------------------------------------------------------------
# One-time parameter preparation (pad / concat / bf16-cast).  Call ONCE.
# ---------------------------------------------------------------------------
def _pad_linear(w, b, in_pad, out_pad):
    w_p = _pad2d(w, in_pad, out_pad).astype(jnp.bfloat16)
    b_p = _pad2d(b.reshape(1, -1), 1, out_pad).astype(jnp.float32)
    return w_p, b_p


def _pad_head(w, b, in_pad, half_pad):
    """(K, 2D) head -> (K_pad, 2*half_pad) = [W_mu | W_log_sigma], each half
    lane-padded so the in-kernel mu / log_sigma split is on a 128-lane boundary."""
    D = w.shape[1] // 2
    w_p = jnp.concatenate([_pad2d(w[:, :D], in_pad, half_pad),
                           _pad2d(w[:, D:], in_pad, half_pad)], axis=1)
    b_p = jnp.concatenate([_pad2d(b[:D].reshape(1, -1), 1, half_pad),
                           _pad2d(b[D:].reshape(1, -1), 1, half_pad)], axis=1)
    return w_p.astype(jnp.bfloat16), b_p.astype(jnp.float32)


def prepare_vae_params(params):
    """Pad/concatenate/cast all weights once, outside the per-step forward."""
    input_size = (params["enc_hidden"][0][0].shape[0] if params["enc_hidden"]
                  else params["enc_head"][0].shape[0])
    bottleneck = params["enc_head"][0].shape[1] // 2
    dx_pad = _ru(input_size, LANE)
    dz_pad = _ru(bottleneck, LANE)

    enc_sizes = [dx_pad] + [_ru(w.shape[1], LANE) for w, _ in params["enc_hidden"]]
    dec_sizes = [dz_pad] + [_ru(w.shape[1], LANE) for w, _ in params["dec_hidden"]]

    return {
        "enc_hidden": [_pad_linear(w, b, fi, fo)
                       for (w, b), fi, fo in zip(params["enc_hidden"],
                                                 enc_sizes[:-1], enc_sizes[1:])],
        "enc_head": _pad_head(*params["enc_head"], enc_sizes[-1], dz_pad),
        "dec_hidden": [_pad_linear(w, b, fi, fo)
                       for (w, b), fi, fo in zip(params["dec_hidden"],
                                                 dec_sizes[:-1], dec_sizes[1:])],
        "dec_head": _pad_head(*params["dec_head"], dec_sizes[-1], dx_pad),
    }


# ---------------------------------------------------------------------------
# Batch-tile choice: >=2 balanced, even-count steps when B >= 64.
# ---------------------------------------------------------------------------
def _choose_batch_tile(B):
    if B < 64:
        return _ru(max(B, 1), SUBLANE)        # too small to pipeline / split
    n_steps = max(2, _cdiv(B, MAX_TB))
    if n_steps % 2:                           # even step count -> clean v7x 2-TC split
        n_steps += 1
    return _ru(_cdiv(B, n_steps), SUBLANE)


def _full_spec(shape, single_buffer):
    idx = lambda i, _n=len(shape): (0,) * _n
    if single_buffer and _HAS_BUFFERED:
        # Grid-invariant block: second pipeline buffer is never used for overlap.
        return pl.BlockSpec(shape, idx, pipeline_mode=pl.Buffered(1))
    return pl.BlockSpec(shape, idx)


# ---------------------------------------------------------------------------
# Forward (returns PADDED outputs; padded mu/z/decoded lanes are exact zeros,
# padded sigma lanes are exp(0)=1).
# ---------------------------------------------------------------------------
def _vae_forward_impl(pp, x, eps_z, eps_x, *, single_buffer):
    enc_hidden = pp["enc_hidden"]
    enc_head_w, enc_head_b = pp["enc_head"]
    dec_hidden = pp["dec_hidden"]
    dec_head_w, dec_head_b = pp["dec_head"]

    dz_pad = enc_head_b.shape[1] // 2
    dx_pad = dec_head_b.shape[1] // 2
    in_pad = enc_hidden[0][0].shape[0] if enc_hidden else enc_head_w.shape[0]

    B = x.shape[0]
    TB = _choose_batch_tile(B)

    # ---- VMEM budgeting (right-sized for v7x 64 MiB / v5e scoped limit) ----
    wb_bufs = 1 if (single_buffer and _HAS_BUFFERED) else 2
    weight_arrays = [a for pair in (enc_hidden + dec_hidden) for a in pair]
    weight_arrays += [enc_head_w, enc_head_b, dec_head_w, dec_head_b]
    weight_bytes = sum(int(a.size) * a.dtype.itemsize for a in weight_arrays)
    widest = max([w.shape[1] for w, _ in enc_hidden + dec_hidden]
                 + [2 * dz_pad, 2 * dx_pad, in_pad])

    def vmem_need(tb):
        io = 2 * 4 * tb * (in_pad + dz_pad + dx_pad)     # x/eps tiles, f32, dbl-buf
        out = 2 * 4 * tb * 3 * (dz_pad + dx_pad)          # 6 outputs, f32, dbl-buf
        act = 3 * 4 * tb * widest                         # live activations (rough)
        return weight_bytes * wb_bufs + io + out + act

    while vmem_need(TB) > VMEM_BUDGET_BYTES and TB > 2 * SUBLANE:
        TB = _ru(max(TB // 2, SUBLANE), SUBLANE)
    vmem_limit = int(min(max(vmem_need(TB) * 5 // 4, 32 << 20), 60 << 20))

    Bp = _ru(B, TB)

    # Per-call activation/noise padding (weights were padded once, offline).
    x_p = _pad2d(x.astype(jnp.float32), Bp, in_pad)
    eps_z_p = _pad2d(eps_z.astype(jnp.float32), Bp, dz_pad)
    eps_x_p = _pad2d(eps_x.astype(jnp.float32), Bp, dx_pad)

    ops = [(x_p, True)]
    for w, b in enc_hidden:
        ops += [(w, False), (b, False)]
    ops += [(enc_head_w, False), (enc_head_b, False), (eps_z_p, True)]
    for w, b in dec_hidden:
        ops += [(w, False), (b, False)]
    ops += [(dec_head_w, False), (dec_head_b, False), (eps_x_p, True)]

    def batch_spec(feat):
        return pl.BlockSpec((TB, feat), lambda i: (i, 0))

    operands = [o for o, _ in ops]
    in_specs = [batch_spec(o.shape[1]) if tiled else _full_spec(o.shape, single_buffer)
                for o, tiled in ops]

    out_feats = (dz_pad, dz_pad, dz_pad, dx_pad, dx_pad, dx_pad)
    out_shapes = tuple(jax.ShapeDtypeStruct((Bp, d), jnp.float32) for d in out_feats)
    out_specs = tuple(batch_spec(d) for d in out_feats)

    kernel = functools.partial(
        _vae_fused_kernel,
        n_enc=len(enc_hidden), n_dec=len(dec_hidden),
        dz_pad=dz_pad, dx_pad=dx_pad)

    mu_z, sig_z, z, mu_x, sig_x, xs = pl.pallas_call(
        kernel,
        grid=(Bp // TB,),
        in_specs=in_specs,
        out_specs=out_specs,
        out_shape=out_shapes,
        compiler_params=pltpu.CompilerParams(
            dimension_semantics=("parallel",),
            vmem_limit_bytes=vmem_limit),
    )(*operands)

    return {"encoded": z, "mu_z": mu_z, "sigma_z": sig_z,
            "decoded": xs, "mu_x": mu_x, "sigma_x": sig_x}


_forward_single = jax.jit(functools.partial(_vae_forward_impl, single_buffer=True))
_forward_double = jax.jit(functools.partial(_vae_forward_impl, single_buffer=False))
_FORWARD_FN = None


def vae_forward_padded(padded_params, x, eps_z, eps_x):
    """Fused VAE forward. Returns lane/batch-padded outputs (no extra HBM copies)."""
    global _FORWARD_FN
    if _FORWARD_FN is None:
        if _HAS_BUFFERED:
            try:
                out = _forward_single(padded_params, x, eps_z, eps_x)
                jax.block_until_ready(out)
                _FORWARD_FN = _forward_single
                return out
            except Exception:  # pipeline_mode unsupported -> default double-buffering
                pass
        _FORWARD_FN = _forward_double
    return _FORWARD_FN(padded_params, x, eps_z, eps_x)


def unpad_outputs(out, batch, input_size, bottleneck):
    """Slice padded outputs back to logical shapes (only when a consumer needs it)."""
    return {
        "encoded": out["encoded"][:batch, :bottleneck],
        "mu_z": out["mu_z"][:batch, :bottleneck],
        "sigma_z": out["sigma_z"][:batch, :bottleneck],
        "decoded": out["decoded"][:batch, :input_size],
        "mu_x": out["mu_x"][:batch, :input_size],
        "sigma_x": out["sigma_x"][:batch, :input_size],
    }


# ---------------------------------------------------------------------------
# Parameter construction (deterministic, synthetic) — PyTorch-style init.
# ---------------------------------------------------------------------------
def init_vae_params(key, input_size, hiddens_encode_sizes, bottleneck_size):
    def lin_params(k, fan_in, fan_out):
        kw, kb = jax.random.split(k)
        scale = 1.0 / jnp.sqrt(jnp.float32(fan_in))
        w = jax.random.uniform(kw, (fan_in, fan_out), jnp.float32, -scale, scale)
        b = jax.random.uniform(kb, (fan_out,), jnp.float32, -scale, scale)
        return w, b

    params = {"enc_hidden": [], "dec_hidden": []}
    keys = jax.random.split(key, 2 * len(hiddens_encode_sizes) + 2)
    ki = 0

    last = input_size
    for h in hiddens_encode_sizes:
        params["enc_hidden"].append(lin_params(keys[ki], last, h)); ki += 1
        last = h
    params["enc_head"] = lin_params(keys[ki], last, 2 * bottleneck_size); ki += 1

    last = bottleneck_size
    for h in hiddens_encode_sizes[::-1]:
        params["dec_hidden"].append(lin_params(keys[ki], last, h)); ki += 1
        last = h
    params["dec_head"] = lin_params(keys[ki], last, 2 * input_size); ki += 1
    return params


# ---------------------------------------------------------------------------
# Pure-JAX reference (f32) for correctness checking.
# ---------------------------------------------------------------------------
def vae_forward_ref(params, x, eps_z, eps_x):
    h = x
    for w, b in params["enc_hidden"]:
        h = jnp.maximum(h @ w + b, 0.0)
    w, b = params["enc_head"]
    q = h @ w + b
    D = q.shape[-1] // 2
    mu_z, sigma_z = q[:, :D], jnp.exp(q[:, D:])
    z = eps_z * sigma_z + mu_z

    h = z
    for w, b in params["dec_hidden"]:
        h = jnp.maximum(h @ w + b, 0.0)
    w, b = params["dec_head"]
    p = h @ w + b
    Dx = p.shape[-1] // 2
    mu_x, sigma_x = p[:, :Dx], jnp.exp(p[:, Dx:])
    xs = eps_x * sigma_x + mu_x
    return {"encoded": z, "mu_z": mu_z, "sigma_z": sigma_z,
            "decoded": xs, "mu_x": mu_x, "sigma_x": sigma_x}


if __name__ == "__main__":
    key = jax.random.PRNGKey(0)
    k_params, k_data = jax.random.split(key)

    input_size, hiddens, bottleneck = 4, [32, 16], 10
    params = init_vae_params(k_params, input_size, hiddens, bottleneck)
    padded_params = prepare_vae_params(params)          # ONCE, outside the step

    # Check both the single-step grid (B=8) and a multi-step pipelined grid (B=96).
    for B in (8, 96):
        kx, kz, ke, k_data = jax.random.split(k_data, 4)
        x = jax.random.normal(kx, (B, input_size), jnp.float32)
        eps_z = jax.random.normal(kz, (B, bottleneck), jnp.float32)
        eps_x = jax.random.normal(ke, (B, input_size), jnp.float32)

        out_padded = vae_forward_padded(padded_params, x, eps_z, eps_x)
        out_padded = jax.block_until_ready(out_padded)
        out = unpad_outputs(out_padded, B, input_size, bottleneck)

        ref = vae_forward_ref(params, x, eps_z, eps_x)
        # bf16 MXU path (f32 accumulation) -> looser tolerance than pure-f32.
        for name in ref:
            assert out[name].shape == ref[name].shape, (B, name)
            assert jnp.allclose(out[name], ref[name], atol=3e-2, rtol=3e-2), (B, name)

    print("KERNEL_OK")
</pallas_src>

<mosaic_0001>
module attributes {stable_mosaic.version = 11 : i64} {
  func.func @_vae_fused_kernel(%arg0: i32, %arg1: memref<8x128xf32, #tpu.memory_space<vmem>>, %arg2: memref<128x128xbf16, #tpu.memory_space<vmem>>, %arg3: memref<1x128xf32, #tpu.memory_space<vmem>>, %arg4: memref<128x128xbf16, #tpu.memory_space<vmem>>, %arg5: memref<1x128xf32, #tpu.memory_space<vmem>>, %arg6: memref<128x256xbf16, #tpu.memory_space<vmem>>, %arg7: memref<1x256xf32, #tpu.memory_space<vmem>>, %arg8: memref<8x128xf32, #tpu.memory_space<vmem>>, %arg9: memref<128x128xbf16, #tpu.memory_space<vmem>>, %arg10: memref<1x128xf32, #tpu.memory_space<vmem>>, %arg11: memref<128x128xbf16, #tpu.memory_space<vmem>>, %arg12: memref<1x128xf32, #tpu.memory_space<vmem>>, %arg13: memref<128x256xbf16, #tpu.memory_space<vmem>>, %arg14: memref<1x256xf32, #tpu.memory_space<vmem>>, %arg15: memref<8x128xf32, #tpu.memory_space<vmem>>, %arg16: memref<8x128xf32, #tpu.memory_space<vmem>>, %arg17: memref<8x128xf32, #tpu.memory_space<vmem>>, %arg18: memref<8x128xf32, #tpu.memory_space<vmem>>, %arg19: memref<8x128xf32, #tpu.memory_space<vmem>>, %arg20: memref<8x128xf32, #tpu.memory_space<vmem>>, %arg21: memref<8x128xf32, #tpu.memory_space<vmem>>) attributes {dimension_semantics = [#tpu.dimension_semantics<parallel>], iteration_bounds = array<i64: 1>, scalar_prefetch = 0 : i64, scratch_operands = 0 : i64, tpu.core_type = #tpu.core_type<tc>, window_params = [{transform_indices = @transform_0, window_bounds = array<i64: 8, 128>}, {pipeline_mode = #tpu.pipeline_mode<synchronous>, transform_indices = @transform_1, window_bounds = array<i64: 128, 128>}, {pipeline_mode = #tpu.pipeline_mode<synchronous>, transform_indices = @transform_2, window_bounds = array<i64: 1, 128>}, {pipeline_mode = #tpu.pipeline_mode<synchronous>, transform_indices = @transform_3, window_bounds = array<i64: 128, 128>}, {pipeline_mode = #tpu.pipeline_mode<synchronous>, transform_indices = @transform_4, window_bounds = array<i64: 1, 128>}, {pipeline_mode = #tpu.pipeline_mode<synchronous>, transform_indices = @transform_5, window_bounds = array<i64: 128, 256>}, {pipeline_mode = #tpu.pipeline_mode<synchronous>, transform_indices = @transform_6, window_bounds = array<i64: 1, 256>}, {transform_indices = @transform_7, window_bounds = array<i64: 8, 128>}, {pipeline_mode = #tpu.pipeline_mode<synchronous>, transform_indices = @transform_8, window_bounds = array<i64: 128, 128>}, {pipeline_mode = #tpu.pipeline_mode<synchronous>, transform_indices = @transform_9, window_bounds = array<i64: 1, 128>}, {pipeline_mode = #tpu.pipeline_mode<synchronous>, transform_indices = @transform_10, window_bounds = array<i64: 128, 128>}, {pipeline_mode = #tpu.pipeline_mode<synchronous>, transform_indices = @transform_11, window_bounds = array<i64: 1, 128>}, {pipeline_mode = #tpu.pipeline_mode<synchronous>, transform_indices = @transform_12, window_bounds = array<i64: 128, 256>}, {pipeline_mode = #tpu.pipeline_mode<synchronous>, transform_indices = @transform_13, window_bounds = array<i64: 1, 256>}, {transform_indices = @transform_14, window_bounds = array<i64: 8, 128>}, {transform_indices = @transform_15, window_bounds = array<i64: 8, 128>}, {transform_indices = @transform_16, window_bounds = array<i64: 8, 128>}, {transform_indices = @transform_17, window_bounds = array<i64: 8, 128>}, {transform_indices = @transform_18, window_bounds = array<i64: 8, 128>}, {transform_indices = @transform_19, window_bounds = array<i64: 8, 128>}, {transform_indices = @transform_20, window_bounds = array<i64: 8, 128>}]} {
    %c0 = arith.constant 0 : index
    %c0_0 = arith.constant 0 : index
    %0 = vector.load %arg1[%c0, %c0_0] : memref<8x128xf32, #tpu.memory_space<vmem>>, vector<8x128xf32>
    %1 = arith.truncf %0 : vector<8x128xf32> to vector<8x128xbf16>
    %c0_1 = arith.constant 0 : index
    %c0_2 = arith.constant 0 : index
    %2 = vector.load %arg2[%c0_1, %c0_2] : memref<128x128xbf16, #tpu.memory_space<vmem>>, vector<128x128xbf16>
    %cst = arith.constant dense<0.000000e+00> : vector<8x128xf32>
    %3 = tpu.matmul %1, %2, %cst {dimension_numbers = #tpu.dot_dimension_numbers<[1], [0], [0], [1], [0, 0, 1, 1], [], []>} : vector<8x128xbf16>, vector<128x128xbf16>, vector<8x128xf32> -> vector<8x128xf32>
    %c0_3 = arith.constant 0 : index
    %c0_4 = arith.constant 0 : index
    %4 = vector.load %arg3[%c0_3, %c0_4] : memref<1x128xf32, #tpu.memory_space<vmem>>, vector<1x128xf32>
    %5 = vector.broadcast %4 : vector<1x128xf32> to vector<8x128xf32>
    %6 = arith.addf %3, %5 : vector<8x128xf32>
    %cst_5 = arith.constant 0.000000e+00 : f32
    %7 = vector.broadcast %cst_5 : f32 to vector<8x128xf32>
    %8 = arith.maximumf %6, %7 : vector<8x128xf32>
    %9 = arith.truncf %8 : vector<8x128xf32> to vector<8x128xbf16>
    %c0_6 = arith.constant 0 : index
    %c0_7 = arith.constant 0 : index
    %10 = vector.load %arg4[%c0_6, %c0_7] : memref<128x128xbf16, #tpu.memory_space<vmem>>, vector<128x128xbf16>
    %cst_8 = arith.constant dense<0.000000e+00> : vector<8x128xf32>
    %11 = tpu.matmul %9, %10, %cst_8 {dimension_numbers = #tpu.dot_dimension_numbers<[1], [0], [0], [1], [0, 0, 1, 1], [], []>} : vector<8x128xbf16>, vector<128x128xbf16>, vector<8x128xf32> -> vector<8x128xf32>
    %c0_9 = arith.constant 0 : index
    %c0_10 = arith.constant 0 : index
    %12 = vector.load %arg5[%c0_9, %c0_10] : memref<1x128xf32, #tpu.memory_space<vmem>>, vector<1x128xf32>
    %13 = vector.broadcast %12 : vector<1x128xf32> to vector<8x128xf32>
    %14 = arith.addf %11, %13 : vector<8x128xf32>
    %cst_11 = arith.constant 0.000000e+00 : f32
    %15 = vector.broadcast %cst_11 : f32 to vector<8x128xf32>
    %16 = arith.maximumf %14, %15 : vector<8x128xf32>
    %17 = arith.truncf %16 : vector<8x128xf32> to vector<8x128xbf16>
    %c0_12 = arith.constant 0 : index
    %c0_13 = arith.constant 0 : index
    %18 = vector.load %arg6[%c0_12, %c0_13] : memref<128x256xbf16, #tpu.memory_space<vmem>>, vector<128x256xbf16>
    %cst_14 = arith.constant dense<0.000000e+00> : vector<8x256xf32>
    %19 = tpu.matmul %17, %18, %cst_14 {dimension_numbers = #tpu.dot_dimension_numbers<[1], [0], [0], [1], [0, 0, 1, 1], [], []>} : vector<8x128xbf16>, vector<128x256xbf16>, vector<8x256xf32> -> vector<8x256xf32>
    %c0_15 = arith.constant 0 : index
    %c0_16 = arith.constant 0 : index
    %20 = vector.load %arg7[%c0_15, %c0_16] : memref<1x256xf32, #tpu.memory_space<vmem>>, vector<1x256xf32>
    %21 = vector.broadcast %20 : vector<1x256xf32> to vector<8x256xf32>
    %22 = arith.addf %19, %21 : vector<8x256xf32>
    %23 = vector.extract_strided_slice %22 {offsets = [0, 0], sizes = [8, 128], strides = [1, 1]} : vector<8x256xf32> to vector<8x128xf32>
    %24 = vector.extract_strided_slice %22 {offsets = [0, 128], sizes = [8, 128], strides = [1, 1]} : vector<8x256xf32> to vector<8x128xf32>
    %25 = math.exp %24 : vector<8x128xf32>
    %c0_17 = arith.constant 0 : index
    %c0_18 = arith.constant 0 : index
    %26 = vector.load %arg8[%c0_17, %c0_18] : memref<8x128xf32, #tpu.memory_space<vmem>>, vector<8x128xf32>
    %27 = arith.mulf %26, %25 : vector<8x128xf32>
    %28 = arith.addf %27, %23 : vector<8x128xf32>
    %c0_19 = arith.constant 0 : index
    %c0_20 = arith.constant 0 : index
    %29 = vector.load %arg16[%c0_19, %c0_20] : memref<8x128xf32, #tpu.memory_space<vmem>>, vector<8x128xf32>
    tpu.vector_store %arg16[%c0_19, %c0_20], %23 {strides = array<i32>} : memref<8x128xf32, #tpu.memory_space<vmem>>, vector<8x128xf32>,
    %c0_21 = arith.constant 0 : index
    %c0_22 = arith.constant 0 : index
    %30 = vector.load %arg17[%c0_21, %c0_22] : memref<8x128xf32, #tpu.memory_space<vmem>>, vector<8x128xf32>
    tpu.vector_store %arg17[%c0_21, %c0_22], %25 {strides = array<i32>} : memref<8x128xf32, #tpu.memory_space<vmem>>, vector<8x128xf32>,
    %c0_23 = arith.constant 0 : index
    %c0_24 = arith.constant 0 : index
    %31 = vector.load %arg18[%c0_23, %c0_24] : memref<8x128xf32, #tpu.memory_space<vmem>>, vector<8x128xf32>
    tpu.vector_store %arg18[%c0_23, %c0_24], %28 {strides = array<i32>} : memref<8x128xf32, #tpu.memory_space<vmem>>, vector<8x128xf32>,
    %32 = arith.truncf %28 : vector<8x128xf32> to vector<8x128xbf16>
    %c0_25 = arith.constant 0 : index
    %c0_26 = arith.constant 0 : index
    %33 = vector.load %arg9[%c0_25, %c0_26] : memref<128x128xbf16, #tpu.memory_space<vmem>>, vector<128x128xbf16>
    %cst_27 = arith.constant dense<0.000000e+00> : vector<8x128xf32>
    %34 = tpu.matmul %32, %33, %cst_27 {dimension_numbers = #tpu.dot_dimension_numbers<[1], [0], [0], [1], [0, 0, 1, 1], [], []>} : vector<8x128xbf16>, vector<128x128xbf16>, vector<8x128xf32> -> vector<8x128xf32>
    %c0_28 = arith.constant 0 : index
    %c0_29 = arith.constant 0 : index
    %35 = vector.load %arg10[%c0_28, %c0_29] : memref<1x128xf32, #tpu.memory_space<vmem>>, vector<1x128xf32>
    %36 = vector.broadcast %35 : vector<1x128xf32> to vector<8x128xf32>
    %37 = arith.addf %34, %36 : vector<8x128xf32>
    %cst_30 = arith.constant 0.000000e+00 : f32
    %38 = vector.broadcast %cst_30 : f32 to vector<8x128xf32>
    %39 = arith.maximumf %37, %38 : vector<8x128xf32>
    %40 = arith.truncf %39 : vector<8x128xf32> to vector<8x128xbf16>
    %c0_31 = arith.constant 0 : index
    %c0_32 = arith.constant 0 : index
    %41 = vector.load %arg11[%c0_31, %c0_32] : memref<128x128xbf16, #tpu.memory_space<vmem>>, vector<128x128xbf16>
    %cst_33 = arith.constant dense<0.000000e+00> : vector<8x128xf32>
    %42 = tpu.matmul %40, %41, %cst_33 {dimension_numbers = #tpu.dot_dimension_numbers<[1], [0], [0], [1], [0, 0, 1, 1], [], []>} : vector<8x128xbf16>, vector<128x128xbf16>, vector<8x128xf32> -> vector<8x128xf32>
    %c0_34 = arith.constant 0 : index
    %c0_35 = arith.constant 0 : index
    %43 = vector.load %arg12[%c0_34, %c0_35] : memref<1x128xf32, #tpu.memory_space<vmem>>, vector<1x128xf32>
    %44 = vector.broadcast %43 : vector<1x128xf32> to vector<8x128xf32>
    %45 = arith.addf %42, %44 : vector<8x128xf32>
    %cst_36 = arith.constant 0.000000e+00 : f32
    %46 = vector.broadcast %cst_36 : f32 to vector<8x128xf32>
    %47 = arith.maximumf %45, %46 : vector<8x128xf32>
    %48 = arith.truncf %47 : vector<8x128xf32> to vector<8x128xbf16>
    %c0_37 = arith.constant 0 : index
    %c0_38 = arith.constant 0 : index
    %49 = vector.load %arg13[%c0_37, %c0_38] : memref<128x256xbf16, #tpu.memory_space<vmem>>, vector<128x256xbf16>
    %cst_39 = arith.constant dense<0.000000e+00> : vector<8x256xf32>
    %50 = tpu.matmul %48, %49, %cst_39 {dimension_numbers = #tpu.dot_dimension_numbers<[1], [0], [0], [1], [0, 0, 1, 1], [], []>} : vector<8x128xbf16>, vector<128x256xbf16>, vector<8x256xf32> -> vector<8x256xf32>
    %c0_40 = arith.constant 0 : index
    %c0_41 = arith.constant 0 : index
    %51 = vector.load %arg14[%c0_40, %c0_41] : memref<1x256xf32, #tpu.memory_space<vmem>>, vector<1x256xf32>
    %52 = vector.broadcast %51 : vector<1x256xf32> to vector<8x256xf32>
    %53 = arith.addf %50, %52 : vector<8x256xf32>
    %54 = vector.extract_strided_slice %53 {offsets = [0, 0], sizes = [8, 128], strides = [1, 1]} : vector<8x256xf32> to vector<8x128xf32>
    %55 = vector.extract_strided_slice %53 {offsets = [0, 128], sizes = [8, 128], strides = [1, 1]} : vector<8x256xf32> to vector<8x128xf32>
    %56 = math.exp %55 : vector<8x128xf32>
    %c0_42 = arith.constant 0 : index
    %c0_43 = arith.constant 0 : index
    %57 = vector.load %arg15[%c0_42, %c0_43] : memref<8x128xf32, #tpu.memory_space<vmem>>, vector<8x128xf32>
    %58 = arith.mulf %57, %56 : vector<8x128xf32>
    %59 = arith.addf %58, %54 : vector<8x128xf32>
    %c0_44 = arith.constant 0 : index
    %c0_45 = arith.constant 0 : index
    %60 = vector.load %arg19[%c0_44, %c0_45] : memref<8x128xf32, #tpu.memory_space<vmem>>, vector<8x128xf32>
    tpu.vector_store %arg19[%c0_44, %c0_45], %54 {strides = array<i32>} : memref<8x128xf32, #tpu.memory_space<vmem>>, vector<8x128xf32>,
    %c0_46 = arith.constant 0 : index
    %c0_47 = arith.constant 0 : index
    %61 = vector.load %arg20[%c0_46, %c0_47] : memref<8x128xf32, #tpu.memory_space<vmem>>, vector<8x128xf32>
    tpu.vector_store %arg20[%c0_46, %c0_47], %56 {strides = array<i32>} : memref<8x128xf32, #tpu.memory_space<vmem>>, vector<8x128xf32>,
    %c0_48 = arith.constant 0 : index
    %c0_49 = arith.constant 0 : index
    %62 = vector.load %arg21[%c0_48, %c0_49] : memref<8x128xf32, #tpu.memory_space<vmem>>, vector<8x128xf32>
    tpu.vector_store %arg21[%c0_48, %c0_49], %59 {strides = array<i32>} : memref<8x128xf32, #tpu.memory_space<vmem>>, vector<8x128xf32>,
    return
  }
  func.func @transform_0(%arg0: i32) -> (i32, i32) {
    %c0_i32 = arith.constant 0 : i32
    %c0_i32_0 = arith.constant 0 : i32
    return %arg0, %c0_i32 : i32, i32
  }
  func.func @transform_1(%arg0: i32) -> (i32, i32) {
    %c0_i32 = arith.constant 0 : i32
    %c0_i32_0 = arith.constant 0 : i32
    %c0_i32_1 = arith.constant 0 : i32
    return %c0_i32, %c0_i32_0 : i32, i32
  }
  func.func @transform_2(%arg0: i32) -> (i32, i32) {
    %c0_i32 = arith.constant 0 : i32
    %c0_i32_0 = arith.constant 0 : i32
    %c0_i32_1 = arith.constant 0 : i32
    return %c0_i32, %c0_i32_0 : i32, i32
  }
  func.func @transform_3(%arg0: i32) -> (i32, i32) {
    %c0_i32 = arith.constant 0 : i32
    %c0_i32_0 = arith.constant 0 : i32
    %c0_i32_1 = arith.constant 0 : i32
    return %c0_i32, %c0_i32_0 : i32, i32
  }
  func.func @transform_4(%arg0: i32) -> (i32, i32) {
    %c0_i32 = arith.constant 0 : i32
    %c0_i32_0 = arith.constant 0 : i32
    %c0_i32_1 = arith.constant 0 : i32
    return %c0_i32, %c0_i32_0 : i32, i32
  }
  func.func @transform_5(%arg0: i32) -> (i32, i32) {
    %c0_i32 = arith.constant 0 : i32
    %c0_i32_0 = arith.constant 0 : i32
    %c0_i32_1 = arith.constant 0 : i32
    return %c0_i32, %c0_i32_0 : i32, i32
  }
  func.func @transform_6(%arg0: i32) -> (i32, i32) {
    %c0_i32 = arith.constant 0 : i32
    %c0_i32_0 = arith.constant 0 : i32
    %c0_i32_1 = arith.constant 0 : i32
    return %c0_i32, %c0_i32_0 : i32, i32
  }
  func.func @transform_7(%arg0: i32) -> (i32, i32) {
    %c0_i32 = arith.constant 0 : i32
    %c0_i32_0 = arith.constant 0 : i32
    return %arg0, %c0_i32 : i32, i32
  }
  func.func @transform_8(%arg0: i32) -> (i32, i32) {
    %c0_i32 = arith.constant 0 : i32
    %c0_i32_0 = arith.constant 0 : i32
    %c0_i32_1 = arith.constant 0 : i32
    return %c0_i32, %c0_i32_0 : i32, i32
  }
  func.func @transform_9(%arg0: i32) -> (i32, i32) {
    %c0_i32 = arith.constant 0 : i32
    %c0_i32_0 = arith.constant 0 : i32
    %c0_i32_1 = arith.constant 0 : i32
    return %c0_i32, %c0_i32_0 : i32, i32
  }
  func.func @transform_10(%arg0: i32) -> (i32, i32) {
    %c0_i32 = arith.constant 0 : i32
    %c0_i32_0 = arith.constant 0 : i32
    %c0_i32_1 = arith.constant 0 : i32
    return %c0_i32, %c0_i32_0 : i32, i32
  }
  func.func @transform_11(%arg0: i32) -> (i32, i32) {
    %c0_i32 = arith.constant 0 : i32
    %c0_i32_0 = arith.constant 0 : i32
    %c0_i32_1 = arith.constant 0 : i32
    return %c0_i32, %c0_i32_0 : i32, i32
  }
  func.func @transform_12(%arg0: i32) -> (i32, i32) {
    %c0_i32 = arith.constant 0 : i32
    %c0_i32_0 = arith.constant 0 : i32
    %c0_i32_1 = arith.constant 0 : i32
    return %c0_i32, %c0_i32_0 : i32, i32
  }
  func.func @transform_13(%arg0: i32) -> (i32, i32) {
    %c0_i32 = arith.constant 0 : i32
    %c0_i32_0 = arith.constant 0 : i32
    %c0_i32_1 = arith.constant 0 : i32
    return %c0_i32, %c0_i32_0 : i32, i32
  }
  func.func @transform_14(%arg0: i32) -> (i32, i32) {
    %c0_i32 = arith.constant 0 : i32
    %c0_i32_0 = arith.constant 0 : i32
    return %arg0, %c0_i32 : i32, i32
  }
  func.func @transform_15(%arg0: i32) -> (i32, i32) {
    %c0_i32 = arith.constant 0 : i32
    %c0_i32_0 = arith.constant 0 : i32
    return %arg0, %c0_i32 : i32, i32
  }
  func.func @transform_16(%arg0: i32) -> (i32, i32) {
    %c0_i32 = arith.constant 0 : i32
    %c0_i32_0 = arith.constant 0 : i32
    return %arg0, %c0_i32 : i32, i32
  }
  func.func @transform_17(%arg0: i32) -> (i32, i32) {
    %c0_i32 = arith.constant 0 : i32
    %c0_i32_0 = arith.constant 0 : i32
    return %arg0, %c0_i32 : i32, i32
  }
  func.func @transform_18(%arg0: i32) -> (i32, i32) {
    %c0_i32 = arith.constant 0 : i32
    %c0_i32_0 = arith.constant 0 : i32
    return %arg0, %c0_i32 : i32, i32
  }
  func.func @transform_19(%arg0: i32) -> (i32, i32) {
    %c0_i32 = arith.constant 0 : i32
    %c0_i32_0 = arith.constant 0 : i32
    return %arg0, %c0_i32 : i32, i32
  }
  func.func @transform_20(%arg0: i32) -> (i32, i32) {
    %c0_i32 = arith.constant 0 : i32
    %c0_i32_0 = arith.constant 0 : i32
    return %arg0, %c0_i32 : i32, i32
  }
}

module attributes {stable_mosaic.version = 11 : i64} {
  func.func @_vae_fused_kernel(%arg0: i32, %arg1: memref<8x128xf32, #tpu.memory_space<vmem>>, %arg2: memref<128x128xbf16, #tpu.memory_space<vmem>>, %arg3: memref<1x128xf32, #tpu.memory_space<vmem>>, %arg4: memref<128x128xbf16, #tpu.memory_space<vmem>>, %arg5: memref<1x128xf32, #tpu.memory_space<vmem>>, %arg6: memref<128x256xbf16, #tpu.memory_space<vmem>>, %arg7: memref<1x256xf32, #tpu.memory_space<vmem>>, %arg8: memref<8x128xf32, #tpu.memory_space<vmem>>, %arg9: memref<128x128xbf16, #tpu.memory_space<vmem>>, %arg10: memref<1x128xf32, #tpu.memory_space<vmem>>, %arg11: memref<128x128xbf16, #tpu.memory_space<vmem>>, %arg12: memref<1x128xf32, #tpu.memory_space<vmem>>, %arg13: memref<128x256xbf16, #tpu.memory_space<vmem>>, %arg14: memref<1x256xf32, #tpu.memory_space<vmem>>, %arg15: memref<8x128xf32, #tpu.memory_space<vmem>>, %arg16: memref<8x128xf32, #tpu.memory_space<vmem>>, %arg17: memref<8x128xf32, #tpu.memory_space<vmem>>, %arg18: memref<8x128xf32, #tpu.memory_space<vmem>>, %arg19: memref<8x128xf32, #tpu.memory_space<vmem>>, %arg20: memref<8x128xf32, #tpu.memory_space<vmem>>, %arg21: memref<8x128xf32, #tpu.memory_space<vmem>>) attributes {dimension_semantics = [#tpu.dimension_semantics<parallel>], iteration_bounds = array<i64: 1>, scalar_prefetch = 0 : i64, scratch_operands = 0 : i64, tpu.core_type = #tpu.core_type<tc>, window_params = [{transform_indices = @transform_0, window_bounds = array<i64: 8, 128>}, {pipeline_mode = #tpu.pipeline_mode<synchronous>, transform_indices = @transform_1, window_bounds = array<i64: 128, 128>}, {pipeline_mode = #tpu.pipeline_mode<synchronous>, transform_indices = @transform_2, window_bounds = array<i64: 1, 128>}, {pipeline_mode = #tpu.pipeline_mode<synchronous>, transform_indices = @transform_3, window_bounds = array<i64: 128, 128>}, {pipeline_mode = #tpu.pipeline_mode<synchronous>, transform_indices = @transform_4, window_bounds = array<i64: 1, 128>}, {pipeline_mode = #tpu.pipeline_mode<synchronous>, transform_indices = @transform_5, window_bounds = array<i64: 128, 256>}, {pipeline_mode = #tpu.pipeline_mode<synchronous>, transform_indices = @transform_6, window_bounds = array<i64: 1, 256>}, {transform_indices = @transform_7, window_bounds = array<i64: 8, 128>}, {pipeline_mode = #tpu.pipeline_mode<synchronous>, transform_indices = @transform_8, window_bounds = array<i64: 128, 128>}, {pipeline_mode = #tpu.pipeline_mode<synchronous>, transform_indices = @transform_9, window_bounds = array<i64: 1, 128>}, {pipeline_mode = #tpu.pipeline_mode<synchronous>, transform_indices = @transform_10, window_bounds = array<i64: 128, 128>}, {pipeline_mode = #tpu.pipeline_mode<synchronous>, transform_indices = @transform_11, window_bounds = array<i64: 1, 128>}, {pipeline_mode = #tpu.pipeline_mode<synchronous>, transform_indices = @transform_12, window_bounds = array<i64: 128, 256>}, {pipeline_mode = #tpu.pipeline_mode<synchronous>, transform_indices = @transform_13, window_bounds = array<i64: 1, 256>}, {transform_indices = @transform_14, window_bounds = array<i64: 8, 128>}, {transform_indices = @transform_15, window_bounds = array<i64: 8, 128>}, {transform_indices = @transform_16, window_bounds = array<i64: 8, 128>}, {transform_indices = @transform_17, window_bounds = array<i64: 8, 128>}, {transform_indices = @transform_18, window_bounds = array<i64: 8, 128>}, {transform_indices = @transform_19, window_bounds = array<i64: 8, 128>}, {transform_indices = @transform_20, window_bounds = array<i64: 8, 128>}]} {
    %c0 = arith.constant 0 : index
    %c0_0 = arith.constant 0 : index
    %0 = vector.load %arg1[%c0, %c0_0] : memref<8x128xf32, #tpu.memory_space<vmem>>, vector<8x128xf32>
    %1 = arith.truncf %0 : vector<8x128xf32> to vector<8x128xbf16>
    %c0_1 = arith.constant 0 : index
    %c0_2 = arith.constant 0 : index
    %2 = vector.load %arg2[%c0_1, %c0_2] : memref<128x128xbf16, #tpu.memory_space<vmem>>, vector<128x128xbf16>
    %cst = arith.constant dense<0.000000e+00> : vector<8x128xf32>
    %3 = tpu.matmul %1, %2, %cst {dimension_numbers = #tpu.dot_dimension_numbers<[1], [0], [0], [1], [0, 0, 1, 1], [], []>} : vector<8x128xbf16>, vector<128x128xbf16>, vector<8x128xf32> -> vector<8x128xf32>
    %c0_3 = arith.constant 0 : index
    %c0_4 = arith.constant 0 : index
    %4 = vector.load %arg3[%c0_3, %c0_4] : memref<1x128xf32, #tpu.memory_space<vmem>>, vector<1x128xf32>
    %5 = vector.broadcast %4 : vector<1x128xf32> to vector<8x128xf32>
    %6 = arith.addf %3, %5 : vector<8x128xf32>
    %cst_5 = arith.constant 0.000000e+00 : f32
    %7 = vector.broadcast %cst_5 : f32 to vector<8x128xf32>
    %8 = arith.maximumf %6, %7 : vector<8x128xf32>
    %9 = arith.truncf %8 : vector<8x128xf32> to vector<8x128xbf16>
    %c0_6 = arith.constant 0 : index
    %c0_7 = arith.constant 0 : index
    %10 = vector.load %arg4[%c0_6, %c0_7] : memref<128x128xbf16, #tpu.memory_space<vmem>>, vector<128x128xbf16>
    %cst_8 = arith.constant dense<0.000000e+00> : vector<8x128xf32>
    %11 = tpu.matmul %9, %10, %cst_8 {dimension_numbers = #tpu.dot_dimension_numbers<[1], [0], [0], [1], [0, 0, 1, 1], [], []>} : vector<8x128xbf16>, vector<128x128xbf16>, vector<8x128xf32> -> vector<8x128xf32>
    %c0_9 = arith.constant 0 : index
    %c0_10 = arith.constant 0 : index
    %12 = vector.load %arg5[%c0_9, %c0_10] : memref<1x128xf32, #tpu.memory_space<vmem>>, vector<1x128xf32>
    %13 = vector.broadcast %12 : vector<1x128xf32> to vector<8x128xf32>
    %14 = arith.addf %11, %13 : vector<8x128xf32>
    %cst_11 = arith.constant 0.000000e+00 : f32
    %15 = vector.broadcast %cst_11 : f32 to vector<8x128xf32>
    %16 = arith.maximumf %14, %15 : vector<8x128xf32>
    %17 = arith.truncf %16 : vector<8x128xf32> to vector<8x128xbf16>
    %c0_12 = arith.constant 0 : index
    %c0_13 = arith.constant 0 : index
    %18 = vector.load %arg6[%c0_12, %c0_13] : memref<128x256xbf16, #tpu.memory_space<vmem>>, vector<128x256xbf16>
    %cst_14 = arith.constant dense<0.000000e+00> : vector<8x256xf32>
    %19 = tpu.matmul %17, %18, %cst_14 {dimension_numbers = #tpu.dot_dimension_numbers<[1], [0], [0], [1], [0, 0, 1, 1], [], []>} : vector<8x128xbf16>, vector<128x256xbf16>, vector<8x256xf32> -> vector<8x256xf32>
    %c0_15 = arith.constant 0 : index
    %c0_16 = arith.constant 0 : index
    %20 = vector.load %arg7[%c0_15, %c0_16] : memref<1x256xf32, #tpu.memory_space<vmem>>, vector<1x256xf32>
    %21 = vector.broadcast %20 : vector<1x256xf32> to vector<8x256xf32>
    %22 = arith.addf %19, %21 : vector<8x256xf32>
    %23 = vector.extract_strided_slice %22 {offsets = [0, 0], sizes = [8, 128], strides = [1, 1]} : vector<8x256xf32> to vector<8x128xf32>
    %24 = vector.extract_strided_slice %22 {offsets = [0, 128], sizes = [8, 128], strides = [1, 1]} : vector<8x256xf32> to vector<8x128xf32>
    %25 = math.exp %24 : vector<8x128xf32>
    %c0_17 = arith.constant 0 : index
    %c0_18 = arith.constant 0 : index
    %26 = vector.load %arg8[%c0_17, %c0_18] : memref<8x128xf32, #tpu.memory_space<vmem>>, vector<8x128xf32>
    %27 = arith.mulf %26, %25 : vector<8x128xf32>
    %28 = arith.addf %27, %23 : vector<8x128xf32>
    %c0_19 = arith.constant 0 : index
    %c0_20 = arith.constant 0 : index
    %29 = vector.load %arg16[%c0_19, %c0_20] : memref<8x128xf32, #tpu.memory_space<vmem>>, vector<8x128xf32>
    tpu.vector_store %arg16[%c0_19, %c0_20], %23 {strides = array<i32>} : memref<8x128xf32, #tpu.memory_space<vmem>>, vector<8x128xf32>,
    %c0_21 = arith.constant 0 : index
    %c0_22 = arith.constant 0 : index
    %30 = vector.load %arg17[%c0_21, %c0_22] : memref<8x128xf32, #tpu.memory_space<vmem>>, vector<8x128xf32>
    tpu.vector_store %arg17[%c0_21, %c0_22], %25 {strides = array<i32>} : memref<8x128xf32, #tpu.memory_space<vmem>>, vector<8x128xf32>,
    %c0_23 = arith.constant 0 : index
    %c0_24 = arith.constant 0 : index
    %31 = vector.load %arg18[%c0_23, %c0_24] : memref<8x128xf32, #tpu.memory_space<vmem>>, vector<8x128xf32>
    tpu.vector_store %arg18[%c0_23, %c0_24], %28 {strides = array<i32>} : memref<8x128xf32, #tpu.memory_space<vmem>>, vector<8x128xf32>,
    %32 = arith.truncf %28 : vector<8x128xf32> to vector<8x128xbf16>
    %c0_25 = arith.constant 0 : index
    %c0_26 = arith.constant 0 : index
    %33 = vector.load %arg9[%c0_25, %c0_26] : memref<128x128xbf16, #tpu.memory_space<vmem>>, vector<128x128xbf16>
    %cst_27 = arith.constant dense<0.000000e+00> : vector<8x128xf32>
    %34 = tpu.matmul %32, %33, %cst_27 {dimension_numbers = #tpu.dot_dimension_numbers<[1], [0], [0], [1], [0, 0, 1, 1], [], []>} : vector<8x128xbf16>, vector<128x128xbf16>, vector<8x128xf32> -> vector<8x128xf32>
    %c0_28 = arith.constant 0 : index
    %c0_29 = arith.constant 0 : index
    %35 = vector.load %arg10[%c0_28, %c0_29] : memref<1x128xf32, #tpu.memory_space<vmem>>, vector<1x128xf32>
    %36 = vector.broadcast %35 : vector<1x128xf32> to vector<8x128xf32>
    %37 = arith.addf %34, %36 : vector<8x128xf32>
    %cst_30 = arith.constant 0.000000e+00 : f32
    %38 = vector.broadcast %cst_30 : f32 to vector<8x128xf32>
    %39 = arith.maximumf %37, %38 : vector<8x128xf32>
    %40 = arith.truncf %39 : vector<8x128xf32> to vector<8x128xbf16>
    %c0_31 = arith.constant 0 : index
    %c0_32 = arith.constant 0 : index
    %41 = vector.load %arg11[%c0_31, %c0_32] : memref<128x128xbf16, #tpu.memory_space<vmem>>, vector<128x128xbf16>
    %cst_33 = arith.constant dense<0.000000e+00> : vector<8x128xf32>
    %42 = tpu.matmul %40, %41, %cst_33 {dimension_numbers = #tpu.dot_dimension_numbers<[1], [0], [0], [1], [0, 0, 1, 1], [], []>} : vector<8x128xbf16>, vector<128x128xbf16>, vector<8x128xf32> -> vector<8x128xf32>
    %c0_34 = arith.constant 0 : index
    %c0_35 = arith.constant 0 : index
    %43 = vector.load %arg12[%c0_34, %c0_35] : memref<1x128xf32, #tpu.memory_space<vmem>>, vector<1x128xf32>
    %44 = vector.broadcast %43 : vector<1x128xf32> to vector<8x128xf32>
    %45 = arith.addf %42, %44 : vector<8x128xf32>
    %cst_36 = arith.constant 0.000000e+00 : f32
    %46 = vector.broadcast %cst_36 : f32 to vector<8x128xf32>
    %47 = arith.maximumf %45, %46 : vector<8x128xf32>
    %48 = arith.truncf %47 : vector<8x128xf32> to vector<8x128xbf16>
    %c0_37 = arith.constant 0 : index
    %c0_38 = arith.constant 0 : index
    %49 = vector.load %arg13[%c0_37, %c0_38] : memref<128x256xbf16, #tpu.memory_space<vmem>>, vector<128x256xbf16>
    %cst_39 = arith.constant dense<0.000000e+00> : vector<8x256xf32>
    %50 = tpu.matmul %48, %49, %cst_39 {dimension_numbers = #tpu.dot_dimension_numbers<[1], [0], [0], [1], [0, 0, 1, 1], [], []>} : vector<8x128xbf16>, vector<128x256xbf16>, vector<8x256xf32> -> vector<8x256xf32>
    %c0_40 = arith.constant 0 : index
    %c0_41 = arith.constant 0 : index
    %51 = vector.load %arg14[%c0_40, %c0_41] : memref<1x256xf32, #tpu.memory_space<vmem>>, vector<1x256xf32>
    %52 = vector.broadcast %51 : vector<1x256xf32> to vector<8x256xf32>
    %53 = arith.addf %50, %52 : vector<8x256xf32>
    %54 = vector.extract_strided_slice %53 {offsets = [0, 0], sizes = [8, 128], strides = [1, 1]} : vector<8x256xf32> to vector<8x128xf32>
    %55 = vector.extract_strided_slice %53 {offsets = [0, 128], sizes = [8, 128], strides = [1, 1]} : vector<8x256xf32> to vector<8x128xf32>
    %56 = math.exp %55 : vector<8x128xf32>
    %c0_42 = arith.constant 0 : index
    %c0_43 = arith.constant 0 : index
    %57 = vector.load %arg15[%c0_42, %c0_43] : memref<8x128xf32, #tpu.memory_space<vmem>>, vector<8x128xf32>
    %58 = arith.mulf %57, %56 : vector<8x128xf32>
    %59 = arith.addf %58, %54 : vector<8x128xf32>
    %c0_44 = arith.constant 0 : index
    %c0_45 = arith.constant 0 : index
    %60 = vector.load %arg19[%c0_44, %c0_45] : memref<8x128xf32, #tpu.memory_space<vmem>>, vector<8x128xf32>
    tpu.vector_store %arg19[%c0_44, %c0_45], %54 {strides = array<i32>} : memref<8x128xf32, #tpu.memory_space<vmem>>, vector<8x128xf32>,
    %c0_46 = arith.constant 0 : index
    %c0_47 = arith.constant 0 : index
    %61 = vector.load %arg20[%c0_46, %c0_47] : memref<8x128xf32, #tpu.memory_space<vmem>>, vector<8x128xf32>
    tpu.vector_store %arg20[%c0_46, %c0_47], %56 {strides = array<i32>} : memref<8x128xf32, #tpu.memory_space<vmem>>, vector<8x128xf32>,
    %c0_48 = arith.constant 0 : index
    %c0_49 = arith.constant 0 : index
    %62 = vector.load %arg21[%c0_48, %c0_49] : memref<8x128xf32, #tpu.memory_space<vmem>>, vector<8x128xf32>
    tpu.vector_store %arg21[%c0_48, %c0_49], %59 {strides = array<i32>} : memref<8x128xf32, #tpu.memory_space<vmem>>, vector<8x128xf32>,
    return
  }
  func.func @transform_0(%arg0: i32) -> (i32, i32) {
    %c0_i32 = arith.constant 0 : i32
    %c0_i32_0 = arith.constant 0 : i32
    return %arg0, %c0_i32 : i32, i32
  }
  func.func @transform_1(%arg0: i32) -> (i32, i32) {
    %c0_i32 = arith.constant 0 : i32
    %c0_i32_0 = arith.constant 0 : i32
    %c0_i32_1 = arith.constant 0 : i32
    return %c0_i32, %c0_i32_0 : i32, i32
  }
  func.func @transform_2(%arg0: i32) -> (i32, i32) {
    %c0_i32 = arith.constant 0 : i32
    %c0_i32_0 = arith.constant 0 : i32
    %c0_i32_1 = arith.constant 0 : i32
    return %c0_i32, %c0_i32_0 : i32, i32
  }
  func.func @transform_3(%arg0: i32) -> (i32, i32) {
    %c0_i32 = arith.constant 0 : i32
    %c0_i32_0 = arith.constant 0 : i32
    %c0_i32_1 = arith.constant 0 : i32
    return %c0_i32, %c0_i32_0 : i32, i32
  }
  func.func @transform_4(%arg0: i32) -> (i32, i32) {
    %c0_i32 = arith.constant 0 : i32
    %c0_i32_0 = arith.constant 0 : i32
    %c0_i32_1 = arith.constant 0 : i32
    return %c0_i32, %c0_i32_0 : i32, i32
  }
  func.func @transform_5(%arg0: i32) -> (i32, i32) {
    %c0_i32 = arith.constant 0 : i32
    %c0_i32_0 = arith.constant 0 : i32
    %c0_i32_1 = arith.constant 0 : i32
    return %c0_i32, %c0_i32_0 : i32, i32
  }
  func.func @transform_6(%arg0: i32) -> (i32, i32) {
    %c0_i32 = arith.constant 0 : i32
    %c0_i32_0 = arith.constant 0 : i32
    %c0_i32_1 = arith.constant 0 : i32
    return %c0_i32, %c0_i32_0 : i32, i32
  }
  func.func @transform_7(%arg0: i32) -> (i32, i32) {
    %c0_i32 = arith.constant 0 : i32
    %c0_i32_0 = arith.constant 0 : i32
    return %arg0, %c0_i32 : i32, i32
  }
  func.func @transform_8(%arg0: i32) -> (i32, i32) {
    %c0_i32 = arith.constant 0 : i32
    %c0_i32_0 = arith.constant 0 : i32
    %c0_i32_1 = arith.constant 0 : i32
    return %c0_i32, %c0_i32_0 : i32, i32
  }
  func.func @transform_9(%arg0: i32) -> (i32, i32) {
    %c0_i32 = arith.constant 0 : i32
    %c0_i32_0 = arith.constant 0 : i32
    %c0_i32_1 = arith.constant 0 : i32
    return %c0_i32, %c0_i32_0 : i32, i32
  }
  func.func @transform_10(%arg0: i32) -> (i32, i32) {
    %c0_i32 = arith.constant 0 : i32
    %c0_i32_0 = arith.constant 0 : i32
    %c0_i32_1 = arith.constant 0 : i32
    return %c0_i32, %c0_i32_0 : i32, i32
  }
  func.func @transform_11(%arg0: i32) -> (i32, i32) {
    %c0_i32 = arith.constant 0 : i32
    %c0_i32_0 = arith.constant 0 : i32
    %c0_i32_1 = arith.constant 0 : i32
    return %c0_i32, %c0_i32_0 : i32, i32
  }
  func.func @transform_12(%arg0: i32) -> (i32, i32) {
    %c0_i32 = arith.constant 0 : i32
    %c0_i32_0 = arith.constant 0 : i32
    %c0_i32_1 = arith.constant 0 : i32
    return %c0_i32, %c0_i32_0 : i32, i32
  }
  func.func @transform_13(%arg0: i32) -> (i32, i32) {
    %c0_i32 = arith.constant 0 : i32
    %c0_i32_0 = arith.constant 0 : i32
    %c0_i32_1 = arith.constant 0 : i32
    return %c0_i32, %c0_i32_0 : i32, i32
  }
  func.func @transform_14(%arg0: i32) -> (i32, i32) {
    %c0_i32 = arith.constant 0 : i32
    %c0_i32_0 = arith.constant 0 : i32
    return %arg0, %c0_i32 : i32, i32
  }
  func.func @transform_15(%arg0: i32) -> (i32, i32) {
    %c0_i32 = arith.constant 0 : i32
    %c0_i32_0 = arith.constant 0 : i32
    return %arg0, %c0_i32 : i32, i32
  }
  func.func @transform_16(%arg0: i32) -> (i32, i32) {
    %c0_i32 = arith.constant 0 : i32
    %c0_i32_0 = arith.constant 0 : i32
    return %arg0, %c0_i32 : i32, i32
  }
  func.func @transform_17(%arg0: i32) -> (i32, i32) {
    %c0_i32 = arith.constant 0 : i32
    %c0_i32_0 = arith.constant 0 : i32
    return %arg0, %c0_i32 : i32, i32
  }
  func.func @transform_18(%arg0: i32) -> (i32, i32) {
    %c0_i32 = arith.constant 0 : i32
    %c0_i32_0 = arith.constant 0 : i32
    return %arg0, %c0_i32 : i32, i32
  }
  func.func @transform_19(%arg0: i32) -> (i32, i32) {
    %c0_i32 = arith.constant 0 : i32
    %c0_i32_0 = arith.constant 0 : i32
    return %arg0, %c0_i32 : i32, i32
  }
  func.func @transform_20(%arg0: i32) -> (i32, i32) {
    %c0_i32 = arith.constant 0 : i32
    %c0_i32_0 = arith.constant 0 : i32
    return %arg0, %c0_i32 : i32, i32
  }
}

</mosaic_0001>

<bundles_post_ra>
// kernel: _vae_forward_impl.1
= control target key start
LH: loop header
LB: loop body
LE: loop exit
PB: predicated region body
PF: predicated region fallthrough
CT: control target
= control target key end

     0   :  { %s1900_s0 = inlined_call_operand.vmem [shape: f32[8,128], index: 0, kind: input, shape index: {}]   ;;  %s1901_s1 = inlined_call_operand.vmem [shape: bf16[128,128], index: 1, kind: input, shape index: {}]   ;;  %s1902_s2 = inlined_call_operand.vmem [shape: f32[1,128], index: 2, kind: input, shape index: {}]   ;;  %s1903_s3 = inlined_call_operand.hbm [shape: bf16[128,128], index: 3, kind: input, shape index: {}]   ;;  %s1904_s4 = inlined_call_operand.vmem [shape: f32[1,128], index: 4, kind: input, shape index: {}]   ;;  %s1905_s5 = inlined_call_operand.hbm [shape: bf16[128,256], index: 5, kind: input, shape index: {}]   ;;  %s1906_s6 = inlined_call_operand.vmem [shape: f32[1,256], index: 6, kind: input, shape index: {}]   ;;  %s1907_s7 = inlined_call_operand.vmem [shape: f32[8,128], index: 7, kind: input, shape index: {}]   ;;  %s1908_s8 = inlined_call_operand.hbm [shape: bf16[128,128], index: 8, kind: input, shape index: {}]   ;;  %s1909_s9 = inlined_call_operand.vmem [shape: f32[1,128], index: 9, kind: input, shape index: {}]   ;;  %s1910_s10 = inlined_call_operand.hbm [shape: bf16[128,128], index: 10, kind: input, shape index: {}]   ;;  %s1911_s11 = inlined_call_operand.vmem [shape: f32[1,128], index: 11, kind: input, shape index: {}]   ;;  %s1912_s12 = inlined_call_operand.hbm [shape: bf16[128,256], index: 12, kind: input, shape index: {}]   ;;  %s1913_s13 = inlined_call_operand.vmem [shape: f32[1,256], index: 13, kind: input, shape index: {}]   ;;  %s1914_s14 = inlined_call_operand.vmem [shape: f32[8,128], index: 14, kind: input, shape index: {}]   ;;  %s1915_s15 = inlined_call_operand.hbm [shape: f32[8,128], index: 15, kind: output, shape index: {0}]   ;;  %s1916_s16 = inlined_call_operand.hbm [shape: f32[8,128], index: 16, kind: output, shape index: {1}]   ;;  %s1917_s17 = inlined_call_operand.hbm [shape: f32[8,128], index: 17, kind: output, shape index: {2}]   ;;  %s1918_s18 = inlined_call_operand.hbm [shape: f32[8,128], index: 18, kind: output, shape index: {3}]   ;;  %s1919_s19 = inlined_call_operand.hbm [shape: f32[8,128], index: 19, kind: output, shape index: {4}]   ;;  %s1920_s20 = inlined_call_operand.hbm [shape: f32[8,128], index: 20, kind: output, shape index: {5}]  }
   0x1   :  { %1925 = sst [smem:[#allocation27_spill]] %s1900_s0 }
   0x2   :  { %1926 = sst [smem:[#allocation28_spill]] %s1901_s1 }
   0x3   :  { %1927 = sst [smem:[#allocation29_spill]] %s1902_s2 }
   0x4   :  { %1928 = sst [smem:[#allocation30_spill]] %s1903_s3 }
   0x5   :  { %1929 = sst [smem:[#allocation31_spill]] %s1904_s4 }
   0x6   :  { %1930 = sst [smem:[#allocation32_spill]] %s1920_s20 }
   0x7   :  { %26 = vsyncpa [#allocation3], 0 }
   0x8   :  { %27 = vsyncpa [#allocation6], 0 }
   0x9   :  { %28 = vsyncpa [#allocation9], 0 }
   0xa   :  { %29 = vsyncpa [#allocation4], 0 }
   0xb   :  { %30 = vsyncpa [#allocation13], 0 }
   0xc   :  { %31 = vsyncpa [#allocation16], 0 }
   0xd   :  { %32 = vsyncpa [#allocation19], 0  ;;  %s1525_s1 = smov [#allocation5]   ;;  %s1269_s2 = scalar_lea.hbm %s1905_s5, 2048 }
   0xe   :  { %s58_s22 = sshll.u32 %s1525_s1, 4  ;;  %p1270_p0 = scmp.ne.s32.totalorder %s1905_s5, %s1269_s2  ;;  %s59_s22 = int_to_ptr.vmem [resolvable:$true] %s58_s22 }
   0xf   :  { %p1273_p1 = scmp.lt.u32.totalorder %s1269_s2, %s1905_s5 }
  0x11   :  { %p1275_p2 = pnand %p1273_p1, %p1270_p0 }
  0x13   :  { %1278 = shalt.err (!%p1275_p2)
}
  0x14   :  { %s1279_s28 = scalar_lea.vmem %s59_s22, 2048  ;;  %p1284_p4 = scmp.lt.s32.totalorder %s59_s22, %s59_s22 }
  0x15   :  { %p1280_p3 = scmp.ne.s32.totalorder %s59_s22, %s1279_s28  ;;  %p1285_p5 = scmp.lt.s32.totalorder %s1279_s28, %s1279_s28 }
  0x17   :  { %p1286_p6 = por %p1285_p5, %p1284_p4 }
  0x19   :  { %p1287_p7 = pnand %p1286_p6, %p1280_p3 }
  0x1b   :  { %1290 = shalt.err (!%p1287_p7)
}
  0x1c   :  { %s1924_s4 = smov 128   ;;  %s1527_s29 = smov 8  }
  0x1d   :  { %64 = dma.hbm_to_vmem [thread:$0]  %s1905_s5, 2048, %s59_s22, [#allocation6], %s1924_s4, %s1924_s4, %s1527_s29  }
  0x1e   :  { %s1528_s21 = smov [#allocation8]   ;;  %s1529_s23 = smov [#allocation2]  }
  0x1f   :  { %s88_s1 = sshll.u32 %s1528_s21, 4  ;;  %s44_s24 = sshll.u32 %s1529_s23, 4  ;;  %s89_s1 = int_to_ptr.vmem [resolvable:$true] %s88_s1  ;;  %s45_s24 = int_to_ptr.vmem [resolvable:$true] %s44_s24 }
  0x20   :  { %s1291_s3 = scalar_lea.hbm %s1910_s10, 1024 }
  0x21   :  { %p1292_p8 = scmp.ne.s32.totalorder %s1910_s10, %s1291_s3  ;;  %p1295_p9 = scmp.lt.u32.totalorder %s1291_s3, %s1910_s10 }
  0x23   :  { %p1297_p10 = pnand %p1295_p9, %p1292_p8 }
  0x25   :  { %1300 = shalt.err (!%p1297_p10)
}
  0x26   :  { %s1301_s5 = scalar_lea.vmem %s89_s1, 1024  ;;  %p1306_p12 = scmp.lt.s32.totalorder %s89_s1, %s89_s1 }
  0x27   :  { %p1302_p11 = scmp.ne.s32.totalorder %s89_s1, %s1301_s5  ;;  %p1307_p13 = scmp.lt.s32.totalorder %s1301_s5, %s1301_s5 }
  0x29   :  { %p1308_p0 = por %p1307_p13, %p1306_p12 }
  0x2b   :  { %p1309_p1 = pnand %p1308_p0, %p1302_p11 }
  0x2d   :  { %1312 = shalt.err (!%p1309_p1)
}
  0x2e   :  { %s1530_s22 = smov 64   ;;  %s1531_s30 = smov 4  }
  0x2f   :  { %94 = dma.hbm_to_vmem [thread:$0]  %s1910_s10, 1024, %s89_s1, [#allocation9], %s1530_s22, %s1530_s22, %s1531_s30  }
  0x30   :  { %s1931_s2 = sld [smem:[#allocation30_spill]] }
  0x36   :  { %s1313_s25 = scalar_lea.hbm %s1931_s2, 1024 }
  0x37   :  { %p1314_p2 = scmp.ne.s32.totalorder %s1931_s2, %s1313_s25  ;;  %p1317_p3 = scmp.lt.u32.totalorder %s1313_s25, %s1931_s2 }
  0x39   :  { %p1319_p4 = pnand %p1317_p3, %p1314_p2 }
  0x3b   :  { %1322 = shalt.err (!%p1319_p4)
}
  0x3c   :  { %s1323_s5 = scalar_lea.vmem %s45_s24, 1024  ;;  %p1328_p6 = scmp.lt.s32.totalorder %s45_s24, %s45_s24 }
  0x3d   :  { %p1324_p5 = scmp.ne.s32.totalorder %s45_s24, %s1323_s5  ;;  %p1329_p7 = scmp.lt.s32.totalorder %s1323_s5, %s1323_s5 }
  0x3f   :  { %p1330_p8 = por %p1329_p7, %p1328_p6 }
  0x41   :  { %p1331_p9 = pnand %p1330_p8, %p1324_p5 }
  0x43   :  { %1334 = shalt.err (!%p1331_p9)
}
  0x44   :  { %50 = dma.hbm_to_vmem [thread:$0]  %s1931_s2, 1024, %s45_s24, [#allocation3], %s1530_s22, %s1530_s22, %s1531_s30  }
  0x45   :  { %s1532_s0 = smov [#allocation7]   ;;  %s1533_s20 = smov [#allocation10]  }
  0x46   :  { %s74_s21 = sshll.u32 %s1532_s0, 4  ;;  %s102_s23 = sshll.u32 %s1533_s20, 4  ;;  %s75_s21 = int_to_ptr.vmem [resolvable:$true] %s74_s21  ;;  %s103_s23 = int_to_ptr.vmem [resolvable:$true] %s102_s23 }
  0x47   :  { %s1335_s26 = scalar_lea.hbm %s1908_s8, 1024 }
  0x48   :  { %p1336_p10 = scmp.ne.s32.totalorder %s1908_s8, %s1335_s26  ;;  %p1339_p11 = scmp.lt.u32.totalorder %s1335_s26, %s1908_s8 }
  0x4a   :  { %p1341_p12 = pnand %p1339_p11, %p1336_p10 }
  0x4c   :  { %1344 = shalt.err (!%p1341_p12)
}
  0x4d   :  { %s1345_s24 = scalar_lea.vmem %s75_s21, 1024  ;;  %p1350_p0 = scmp.lt.s32.totalorder %s75_s21, %s75_s21 }
  0x4e   :  { %p1346_p13 = scmp.ne.s32.totalorder %s75_s21, %s1345_s24  ;;  %p1351_p1 = scmp.lt.s32.totalorder %s1345_s24, %s1345_s24 }
  0x50   :  { %p1352_p2 = por %p1351_p1, %p1350_p0 }
  0x52   :  { %p1353_p3 = pnand %p1352_p2, %p1346_p13 }
  0x54   :  { %1356 = shalt.err (!%p1353_p3)
}
  0x55   :  { %80 = dma.hbm_to_vmem [thread:$0]  %s1908_s8, 1024, %s75_s21, [#allocation6], %s1530_s22, %s1530_s22, %s1531_s30  }
  0x56   :  { %s1357_s0 = scalar_lea.hbm %s1912_s12, 2048 }
  0x57   :  { %p1358_p4 = scmp.ne.s32.totalorder %s1912_s12, %s1357_s0  ;;  %p1361_p5 = scmp.lt.u32.totalorder %s1357_s0, %s1912_s12 }
  0x59   :  { %p1363_p6 = pnand %p1361_p5, %p1358_p4 }
  0x5b   :  { %1366 = shalt.err (!%p1363_p6)
}
  0x5c   :  { %s1367_s27 = scalar_lea.vmem %s103_s23, 2048  ;;  %p1372_p8 = scmp.lt.s32.totalorder %s103_s23, %s103_s23 }
  0x5d   :  { %p1368_p7 = scmp.ne.s32.totalorder %s103_s23, %s1367_s27  ;;  %p1373_p9 = scmp.lt.s32.totalorder %s1367_s27, %s1367_s27 }
  0x5f   :  { %p1374_p10 = por %p1373_p9, %p1372_p8 }
  0x61   :  { %p1375_p11 = pnand %p1374_p10, %p1368_p7 }
  0x63   :  { %1378 = shalt.err (!%p1375_p11)
}
  0x64   :  { %s1932_s8 = smov 128  }
  0x65   :  { %108 = dma.hbm_to_vmem [thread:$0]  %s1912_s12, 2048, %s103_s23, [#allocation9], %s1932_s8, %s1932_s8, %s1527_s29  }
  0x66   :  { %1511 = dma.done.wait [#allocation3], 1024  }
  0x67   :  { %1512 = vsyncadd [#allocation3], 4294966272 }
  0x68   :  { %1513 = dma.done.wait [#allocation6], 3072  }
  0x69   :  { %1514 = vsyncadd [#allocation6], 4294964224 }
  0x6a   :  { %1515 = dma.done.wait [#allocation9], 3072  }
  0x6b   :  { %1516 = vsyncadd [#allocation9], 4294964224  ;;  %v1534_v0 = vmov 0.0   ;;  %vm1535_vm0 = vmmov 0   ;;  %s1933_s29 = sld [smem:[#allocation28_spill]]  ;;  %v1193_v4 = vld [vmem:[#allocation2] sm:$0xff]  }
  0x6c   :  { %1087 = vmatprep.subr.bf16.mxu0 %v1534_v0  ;;  %1103 = vmatprep.mubr.msk.bf16.mxu0 %vm1535_vm0, %v1534_v0  ;;  %v1194_v6 = vld [vmem:[#allocation2 + $0x8] sm:$0xff]   ;;  %v1195_v8 = vld [vmem:[#allocation2 + $0x10] sm:$0xff]   ;;  %v1196_v10 = vld [vmem:[#allocation2 + $0x18] sm:$0xff]   ;;  %s1934_s30 = sld [smem:[#allocation27_spill]]  ;;  %v1536_v43 = vmov 0   ;;  %s1936_s5 = sld [smem:[#allocation31_spill]] }
  0x6d   :  { %1107 = vmatprep.subr.bf16.mxu1 %v1534_v0  ;;  %1123 = vmatprep.mubr.msk.bf16.mxu1 %vm1535_vm0, %v1534_v0  ;;  %v1197_v12 = vld [vmem:[#allocation2 + $0x20] sm:$0xff]   ;;  %v1198_v15 = vld [vmem:[#allocation2 + $0x28] sm:$0xff]   ;;  %v1199_v17 = vld [vmem:[#allocation2 + $0x30] sm:$0xff]  }
  0x6e   :  { %1108 = vmatpush3.bf16.msra.mxu1 %v1193_v4  ;;  %v1200_v18 = vld [vmem:[#allocation2 + $0x38] sm:$0xff]   ;;  %v1201_v19 = vld [vmem:[#allocation5] ss:$8 sps:$4 sm:$0xff]   ;;  %v1203_v20 = vld [vmem:[#allocation5 + $0x4] ss:$8 sps:$4 sm:$0xff]  }
  0x6f   :  { %1109 = vmatprep.subr.bf16.mxu1 %v1534_v0  ;;  %v1206_v21 = vld [vmem:[#allocation5 + $0x14] ss:$8 sps:$4 sm:$0xff]   ;;  %v1204_v22 = vld [vmem:[#allocation5 + $0x10] ss:$8 sps:$4 sm:$0xff]   ;;  %v1209_v23 = vld [vmem:[#allocation5 + $0x24] ss:$8 sps:$4 sm:$0xff]  }
  0x70   :  { %v1207_v24 = vld [vmem:[#allocation5 + $0x20] ss:$8 sps:$4 sm:$0xff]   ;;  %v1212_v25 = vld [vmem:[#allocation5 + $0x34] ss:$8 sps:$4 sm:$0xff]   ;;  %v1210_v26 = vld [vmem:[#allocation5 + $0x30] ss:$8 sps:$4 sm:$0xff]  }
  0x71   :  { %v1185_v1 = vld [vmem:[%s1933_s29] sm:$0xff]   ;;  %v1186_v2 = vld [vmem:[%s1933_s29 + $0x8] sm:$0xff]   ;;  %v1187_v3 = vld [vmem:[%s1933_s29 + $0x10] sm:$0xff]  }
  0x72   :  { %1088 = vmatpush3.bf16.msra.mxu0 %v1185_v1  ;;  %v1188_v5 = vld [vmem:[%s1933_s29 + $0x18] sm:$0xff]   ;;  %v1189_v7 = vld [vmem:[%s1933_s29 + $0x20] sm:$0xff]   ;;  %1110 = vmatpush3.bf16.msra.mxu1 %v1194_v6  ;;  %v1190_v9 = vld [vmem:[%s1933_s29 + $0x28] sm:$0xff]  }
  0x73   :  { %1089 = vmatprep.subr.bf16.mxu0 %v1534_v0  ;;  %1111 = vmatprep.subr.bf16.mxu1 %v1534_v0  ;;  %v1191_v11 = vld [vmem:[%s1933_s29 + $0x30] sm:$0xff]   ;;  %v1192_v13 = vld [vmem:[%s1933_s29 + $0x38] sm:$0xff]   ;;  %v129_v14 = vld [vmem:[%s1934_s30] sm:$0xff]  ;;  %s1935_s29 = sld [smem:[#allocation29_spill]] }
  0x74   :  { %v130_v16 = vpack.c.bf16 %v129_v14, %v129_v14  ;;  %v1215_v27 = vld [vmem:[#allocation5 + $0x44] ss:$8 sps:$4 sm:$0xff]   ;;  %v1213_v28 = vld [vmem:[#allocation5 + $0x40] ss:$8 sps:$4 sm:$0xff]   ;;  %v1218_v29 = vld [vmem:[#allocation5 + $0x54] ss:$8 sps:$4 sm:$0xff]  }
  0x75   :  { %v1216_v30 = vld [vmem:[#allocation5 + $0x50] ss:$8 sps:$4 sm:$0xff]   ;;  %v1221_v31 = vld [vmem:[#allocation5 + $0x64] ss:$8 sps:$4 sm:$0xff]   ;;  %v1219_v32 = vld [vmem:[#allocation5 + $0x60] ss:$8 sps:$4 sm:$0xff]  }
  0x76   :  { %1090 = vmatpush3.bf16.msra.mxu0 %v1186_v2  ;;  %1112 = vmatpush3.bf16.msra.mxu1 %v1195_v8  ;;  %v1224_v41 = vld [vmem:[#allocation5 + $0x74] ss:$8 sps:$4 sm:$0xff]   ;;  %v1222_v42 = vld [vmem:[#allocation5 + $0x70] ss:$8 sps:$4 sm:$0xff]   ;;  %v1225_v44 = vld [vmem:[#allocation7] sm:$0xff]  }
  0x77   :  { %1091 = vmatprep.subr.bf16.mxu0 %v1534_v0  ;;  %1113 = vmatprep.subr.bf16.mxu1 %v1534_v0  ;;  %v1226_v45 = vld [vmem:[#allocation7 + $0x8] sm:$0xff]   ;;  %v992_v46 = vld [vmem:[%s1936_s5] ss:$0 sm:$0xff]  ;;  %v1227_v54 = vld [vmem:[#allocation7 + $0x10] sm:$0xff]  }
  0x78   :  { %v1228_v55 = vld [vmem:[#allocation7 + $0x18] sm:$0xff]   ;;  %v1229_v56 = vld [vmem:[#allocation7 + $0x20] sm:$0xff]   ;;  %v1230_v57 = vld [vmem:[#allocation7 + $0x28] sm:$0xff]  }
  0x79   :  { %v983_v33 = vld [vmem:[%s1935_s29] ss:$0 sm:$0xff]  ;;  %v1231_v58 = vld [vmem:[#allocation7 + $0x30] sm:$0xff]   ;;  %v1232_v59 = vld [vmem:[#allocation7 + $0x38] sm:$0xff]  }
  0x7a   :  { %1092 = vmatpush3.bf16.msra.mxu0 %v1187_v3  ;;  %1114 = vmatpush3.bf16.msra.mxu1 %v1196_v10  ;;  %v1233_v60 = vld [vmem:[#allocation8] sm:$0xff]   ;;  %v1234_v61 = vld [vmem:[#allocation8 + $0x8] sm:$0xff]   ;;  %v1235_v62 = vld [vmem:[#allocation8 + $0x10] sm:$0xff]   ;;  %v375_v3 = vlaneseq }
  0x7b   :  { %1093 = vmatprep.subr.bf16.mxu0 %v1534_v0  ;;  %1115 = vmatprep.subr.bf16.mxu1 %v1534_v0  ;;  %v1236_v63 = vld [vmem:[#allocation8 + $0x18] sm:$0xff]   ;;  %v1237_v1 = vld [vmem:[#allocation8 + $0x20] sm:$0xff]   ;;  %v1238_v2 = vld [vmem:[#allocation8 + $0x28] sm:$0xff]  }
  0x7c   :  { %v1796_v4 = vshrl.u32 %v375_v3, 7  ;;  %v373_v6 = vld [vmem:[%s1906_s6] sm:$0x3] }
  0x7e   :  { %1094 = vmatpush3.bf16.msra.mxu0 %v1188_v5  ;;  %1116 = vmatpush3.bf16.msra.mxu1 %v1197_v12  ;;  %v377_v5 = vsub.s32 0, %v1796_v4 }
  0x7f   :  { %1095 = vmatprep.subr.bf16.mxu0 %v1534_v0  ;;  %1117 = vmatprep.subr.bf16.mxu1 %v1534_v0 }
  0x80   :  { %v378_v8 = vrot.slane %v373_v6, %v377_v5 }
  0x82   :  { %1096 = vmatpush3.bf16.msra.mxu0 %v1189_v7  ;;  %1118 = vmatpush3.bf16.msra.mxu1 %v1198_v15  ;;  %v381_v7 = vsub.s32 1, %v1796_v4 }
  0x83   :  { %1097 = vmatprep.subr.bf16.mxu0 %v1534_v0  ;;  %1119 = vmatprep.subr.bf16.mxu1 %v1534_v0 }
  0x86   :  { %1098 = vmatpush3.bf16.msra.mxu0 %v1190_v9  ;;  %1120 = vmatpush3.bf16.msra.mxu1 %v1199_v17  ;;  %v382_v9 = vrot.slane %v373_v6, %v381_v7  ;;  %v508_v17 = vld [vmem:[%s1907_s7] sm:$0xff] }
  0x87   :  { %1099 = vmatprep.subr.bf16.mxu0 %v1534_v0  ;;  %1121 = vmatprep.subr.bf16.mxu1 %v1534_v0 }
  0x8a   :  { %1100 = vmatpush3.bf16.msra.mxu0 %v1191_v11  ;;  %1122 = vmatpush3.bf16.msra.mxu1 %v1200_v18 }
  0x8b   :  { %1101 = vmatprep.subr.bf16.mxu0 %v1534_v0  ;;  %1127 = vmatprep.subr.bf16.mxu1 %v1534_v0 }
  0x8e   :  { %1102 = vmatpush3.bf16.msra.mxu0 %v1192_v13 }
  0x8f   :  { %465 = vmatprep.subr.bf16.mxu0 %v1203_v20 }
  0x91   :  { %1104 = vmatmul.mubr.bf16.vlgmr.msra.gmra.mrb[0].mxu0 %v130_v16 }
  0x92   :  { %466 = vmatpush1.bf16.msra.mxu0 %v1201_v19  ;;  %497 = vmatprep.mubr.bf16.mxu0 %v1536_v43 }
  0x93   :  { %467 = vmatprep.subr.bf16.mxu0 %v1206_v21 }
  0x96   :  { %468 = vmatpush1.bf16.msra.mxu0 %v1204_v22  ;;  %v1239_v22 = vld [vmem:[#allocation8 + $0x30] sm:$0xff]  }
  0x97   :  { %469 = vmatprep.subr.bf16.mxu0 %v1209_v23  ;;  %v1240_v23 = vld [vmem:[#allocation8 + $0x38] sm:$0xff]  }
  0x9a   :  { %470 = vmatpush1.bf16.msra.mxu0 %v1207_v24  ;;  %v1241_v24 = vld [vmem:[#allocation10] ss:$8 sps:$4 sm:$0xff]  }
  0x9b   :  { %471 = vmatprep.subr.bf16.mxu0 %v1212_v25  ;;  %v1243_v25 = vld [vmem:[#allocation10 + $0x4] ss:$8 sps:$4 sm:$0xff]  }
  0x9e   :  { %472 = vmatpush1.bf16.msra.mxu0 %v1210_v26  ;;  %v1246_v26 = vld [vmem:[#allocation10 + $0x14] ss:$8 sps:$4 sm:$0xff]  }
  0x9f   :  { %473 = vmatprep.subr.bf16.mxu0 %v1215_v27  ;;  %v1244_v27 = vld [vmem:[#allocation10 + $0x10] ss:$8 sps:$4 sm:$0xff]  }
  0xa2   :  { %474 = vmatpush1.bf16.msra.mxu0 %v1213_v28  ;;  %v1249_v28 = vld [vmem:[#allocation10 + $0x24] ss:$8 sps:$4 sm:$0xff]  }
  0xa3   :  { %475 = vmatprep.subr.bf16.mxu0 %v1218_v29  ;;  %v1247_v29 = vld [vmem:[#allocation10 + $0x20] ss:$8 sps:$4 sm:$0xff]  }
  0xa6   :  { %476 = vmatpush1.bf16.msra.mxu0 %v1216_v30  ;;  %v1252_v30 = vld [vmem:[#allocation10 + $0x34] ss:$8 sps:$4 sm:$0xff]  }
  0xa7   :  { %477 = vmatprep.subr.bf16.mxu0 %v1221_v31  ;;  %v1250_v31 = vld [vmem:[#allocation10 + $0x30] ss:$8 sps:$4 sm:$0xff]  }
  0xaa   :  { %478 = vmatpush1.bf16.msra.mxu0 %v1219_v32  ;;  %v1255_v32 = vld [vmem:[#allocation10 + $0x44] ss:$8 sps:$4 sm:$0xff]  }
  0xab   :  { %479 = vmatprep.subr.bf16.mxu0 %v1224_v41 }
  0xae   :  { %480 = vmatpush1.bf16.msra.mxu0 %v1222_v42 }
  0xaf   :  { %1147 = vmatprep.subr.bf16.mxu0 %v1534_v0 }
 0x164   :  { %v236_v34 = vpop.f32.mrb[0].mxu0 }
 0x165   :  { %v237_v35 = vadd.f32 %v983_v33, %v236_v34  ;;  %v1105_v36 = vpop.f32.mrb[1].mxu0  ;;  %v1258_v33 = vld [vmem:[#allocation10 + $0x54] ss:$8 sps:$4 sm:$0xff]   ;;  %v1256_v34 = vld [vmem:[#allocation10 + $0x50] ss:$8 sps:$4 sm:$0xff]  }
 0x166   :  { %v239_v37 = vpop.f32.mrb[2].mxu0  ;;  %v1259_v36 = vld [vmem:[#allocation10 + $0x60] ss:$8 sps:$4 sm:$0xff]  }
 0x167   :  { %v242_v38 = vmax.f32 %v237_v35, 0.0  ;;  %v1106_v39 = vpop.f32.mrb[3].mxu0  ;;  %v1261_v35 = vld [vmem:[#allocation10 + $0x64] ss:$8 sps:$4 sm:$0xff]   ;;  %v1017_v37 = vld [vmem:[%s1909_s9] ss:$0 sm:$0xff] }
 0x168   :  { %s1537_s9 = smov [#allocation12]  }
 0x169   :  { %v243_v40 = vpack.c.bf16 %v242_v38, %v242_v38  ;;  %s914_s20 = sshll.u32 %s1537_s9, 4  ;;  %s915_s20 = int_to_ptr.vmem [resolvable:$true] %s914_s20 }
 0x16a   :  { %s1379_s25 = scalar_lea.vmem %s915_s20, 128  ;;  %p1384_p13 = scmp.lt.s32.totalorder %s915_s20, %s915_s20 }
 0x16b   :  { %1124 = vmatmul.mubr.bf16.vlgmr.msra.gmra.mrb[0].mxu1 %v243_v40  ;;  %p1380_p12 = scmp.ne.s32.totalorder %s915_s20, %s1379_s25  ;;  %p1385_p0 = scmp.lt.s32.totalorder %s1379_s25, %s1379_s25 }
 0x16c   :  { %1143 = vmatprep.mubr.msk.bf16.mxu1 %vm1535_vm0, %v1534_v0  ;;  %1128 = vmatpush3.bf16.msra.mxu1 %v1225_v44 }
 0x16d   :  { %1129 = vmatprep.subr.bf16.mxu1 %v1534_v0  ;;  %p1386_p1 = por %p1385_p0, %p1384_p13 }
 0x16f   :  { %p1387_p2 = pnand %p1386_p1, %p1380_p12 }
 0x170   :  { %1130 = vmatpush3.bf16.msra.mxu1 %v1226_v45  ;;  %v1264_v45 = vld [vmem:[#allocation10 + $0x74] ss:$8 sps:$4 sm:$0xff]  }
 0x171   :  { %1131 = vmatprep.subr.bf16.mxu1 %v1534_v0 }
 0x174   :  { %1132 = vmatpush3.bf16.msra.mxu1 %v1227_v54 }
 0x175   :  { %1133 = vmatprep.subr.bf16.mxu1 %v1534_v0 }
 0x178   :  { %1134 = vmatpush3.bf16.msra.mxu1 %v1228_v55 }
 0x179   :  { %1135 = vmatprep.subr.bf16.mxu1 %v1534_v0 }
 0x17c   :  { %1136 = vmatpush3.bf16.msra.mxu1 %v1229_v56 }
 0x17d   :  { %1137 = vmatprep.subr.bf16.mxu1 %v1534_v0 }
 0x180   :  { %1138 = vmatpush3.bf16.msra.mxu1 %v1230_v57 }
 0x181   :  { %1139 = vmatprep.subr.bf16.mxu1 %v1534_v0 }
 0x184   :  { %1140 = vmatpush3.bf16.msra.mxu1 %v1231_v58 }
 0x185   :  { %1141 = vmatprep.subr.bf16.mxu1 %v1534_v0 }
 0x188   :  { %1142 = vmatpush3.bf16.msra.mxu1 %v1232_v59 }
 0x189   :  { %849 = vmatprep.subr.bf16.mxu1 %v1243_v25 }
 0x23e   :  { %v349_v47 = vpop.f32.mrb[0].mxu1 }
 0x23f   :  { %v350_v48 = vadd.f32 %v992_v46, %v349_v47  ;;  %v1125_v49 = vpop.f32.mrb[1].mxu1  ;;  %v1262_v46 = vld [vmem:[#allocation10 + $0x70] ss:$8 sps:$4 sm:$0xff]   ;;  %v1026_v47 = vld [vmem:[%s1911_s11] ss:$0 sm:$0xff] }
 0x240   :  { %v352_v50 = vpop.f32.mrb[2].mxu1 }
 0x241   :  { %v355_v51 = vmax.f32 %v350_v48, 0.0  ;;  %v1126_v52 = vpop.f32.mrb[3].mxu1 }
 0x243   :  { %v356_v53 = vpack.c.bf16 %v355_v51, %v355_v51 }
 0x245   :  { %498 = vmatmul.mubr.bf16.vlgmr.msra.gmra.mrb[4].mxu0 %v356_v53 }
 0x246   :  { %1163 = vmatprep.mubr.msk.bf16.mxu0 %vm1535_vm0, %v1534_v0  ;;  %1148 = vmatpush3.bf16.msra.mxu0 %v1233_v60 }
 0x247   :  { %1149 = vmatprep.subr.bf16.mxu0 %v1534_v0 }
 0x24a   :  { %1150 = vmatpush3.bf16.msra.mxu0 %v1234_v61 }
 0x24b   :  { %1151 = vmatprep.subr.bf16.mxu0 %v1534_v0 }
 0x24e   :  { %1152 = vmatpush3.bf16.msra.mxu0 %v1235_v62 }
 0x24f   :  { %1153 = vmatprep.subr.bf16.mxu0 %v1534_v0 }
 0x252   :  { %1154 = vmatpush3.bf16.msra.mxu0 %v1236_v63 }
 0x253   :  { %1155 = vmatprep.subr.bf16.mxu0 %v1534_v0 }
 0x256   :  { %1156 = vmatpush3.bf16.msra.mxu0 %v1237_v1 }
 0x257   :  { %1157 = vmatprep.subr.bf16.mxu0 %v1534_v0 }
 0x25a   :  { %1158 = vmatpush3.bf16.msra.mxu0 %v1238_v2 }
 0x25b   :  { %1159 = vmatprep.subr.bf16.mxu0 %v1534_v0 }
 0x25e   :  { %1160 = vmatpush3.bf16.msra.mxu0 %v1239_v22 }
 0x25f   :  { %1161 = vmatprep.subr.bf16.mxu0 %v1534_v0  ;;  %v1253_v0 = vld [vmem:[#allocation10 + $0x40] ss:$8 sps:$4 sm:$0xff]  }
 0x262   :  { %1162 = vmatpush3.bf16.msra.mxu0 %v1240_v23 }
 0x318   :  { %v499_v10 = vpop.f32.mrb[4].mxu0 }
 0x319   :  { %v500_v11 = vadd.f32 %v499_v10, %v378_v8  ;;  %v501_v12 = vpop.f32.mrb[5].mxu0 }
 0x31a   :  { %v502_v13 = vadd.f32 %v501_v12, %v382_v9  ;;  %v503_v14 = vpop.f32.mrb[6].mxu0 }
 0x31b   :  { %511 = vst [vmem:[#allocation11] sm:$0xff] %v500_v11  ;;  %v504_v15 = vpop.f32.mrb[7].mxu0 }
 0x31c   :  { %v506_v16 = vmul.f32 1.442695, %v502_v13 }
 0x31e   :  { %1265 = vpow2.f32 %v506_v16 }
 0x328   :  { %v1266_v18 = vpop.eup %1265 }
 0x329   :  { %512 = vst [vmem:[#allocation12] sm:$0xff] %v1266_v18  ;;  %v509_v19 = vmul.f32 %v1266_v18, %v508_v17 }
 0x32b   :  { %v510_v20 = vadd.f32 %v509_v19, %v500_v11 }
 0x32d   :  { %v514_v21 = vpack.c.bf16 %v510_v20, %v510_v20  ;;  %513 = vst [vmem:[#allocation14] sm:$0xff] %v510_v20 }
 0x32f   :  { %1144 = vmatmul.mubr.bf16.vlgmr.msra.gmra.mrb[4].mxu1 %v514_v21 }
 0x330   :  { %881 = vmatprep.mubr.bf16.mxu1 %v1536_v43  ;;  %850 = vmatpush1.bf16.msra.mxu1 %v1241_v24 }
 0x331   :  { %851 = vmatprep.subr.bf16.mxu1 %v1246_v26 }
 0x334   :  { %852 = vmatpush1.bf16.msra.mxu1 %v1244_v27 }
 0x335   :  { %853 = vmatprep.subr.bf16.mxu1 %v1249_v28 }
 0x338   :  { %854 = vmatpush1.bf16.msra.mxu1 %v1247_v29 }
 0x339   :  { %855 = vmatprep.subr.bf16.mxu1 %v1252_v30 }
 0x33c   :  { %856 = vmatpush1.bf16.msra.mxu1 %v1250_v31 }
 0x33d   :  { %857 = vmatprep.subr.bf16.mxu1 %v1255_v32 }
 0x340   :  { %858 = vmatpush1.bf16.msra.mxu1 %v1253_v0 }
 0x341   :  { %859 = vmatprep.subr.bf16.mxu1 %v1258_v33 }
 0x344   :  { %860 = vmatpush1.bf16.msra.mxu1 %v1256_v34 }
 0x345   :  { %861 = vmatprep.subr.bf16.mxu1 %v1261_v35 }
 0x348   :  { %862 = vmatpush1.bf16.msra.mxu1 %v1259_v36 }
 0x349   :  { %863 = vmatprep.subr.bf16.mxu1 %v1264_v45 }
 0x34c   :  { %864 = vmatpush1.bf16.msra.mxu1 %v1262_v46 }
 0x402   :  { %v620_v38 = vpop.f32.mrb[4].mxu1 }
 0x403   :  { %v621_v39 = vadd.f32 %v1017_v37, %v620_v38  ;;  %v1145_v40 = vpop.f32.mrb[5].mxu1 }
 0x404   :  { %v623_v41 = vpop.f32.mrb[6].mxu1 }
 0x405   :  { %v626_v42 = vmax.f32 %v621_v39, 0.0  ;;  %v1146_v43 = vpop.f32.mrb[7].mxu1 }
 0x407   :  { %v627_v44 = vpack.c.bf16 %v626_v42, %v626_v42 }
 0x409   :  { %1164 = vmatmul.mubr.bf16.vlgmr.msra.gmra.mrb[8].mxu0 %v627_v44 }
 0x4dc   :  { %v733_v48 = vpop.f32.mrb[8].mxu0 }
 0x4dd   :  { %v734_v49 = vadd.f32 %v1026_v47, %v733_v48  ;;  %v1165_v50 = vpop.f32.mrb[9].mxu0 }
 0x4de   :  { %v736_v51 = vpop.f32.mrb[10].mxu0 }
 0x4df   :  { %v739_v52 = vmax.f32 %v734_v49, 0.0  ;;  %v1166_v53 = vpop.f32.mrb[11].mxu0 }
 0x4e1   :  { %v740_v54 = vpack.c.bf16 %v739_v52, %v739_v52 }
 0x4e3   :  { %882 = vmatmul.mubr.bf16.vlgmr.msra.gmra.mrb[8].mxu1 %v740_v54 }
 0x4e4   :  { %1390 = shalt.err (!%p1387_p2)
}
 0x4e5   :  { %s1391_s26 = scalar_lea.hbm %s1916_s16, 128 }
 0x4e6   :  { %p1392_p3 = scmp.ne.s32.totalorder %s1916_s16, %s1391_s26  ;;  %p1395_p4 = scmp.lt.u32.totalorder %s1391_s26, %s1916_s16 }
 0x4e8   :  { %p1397_p5 = pnand %p1395_p4, %p1392_p3 }
 0x4ea   :  { %1400 = shalt.err (!%p1397_p5)
}
 0x4eb   :  { %917 = dma.vmem_to_hbm [thread:$0]  %s915_s20, 128, %s1916_s16, [#allocation13]  }
 0x4ec   :  { %s1538_s29 = smov [#allocation11]   ;;  %s1539_s28 = smov [#allocation14]  }
 0x4ed   :  { %s904_s23 = sshll.u32 %s1538_s29, 4  ;;  %s924_s5 = sshll.u32 %s1539_s28, 4  ;;  %s905_s23 = int_to_ptr.vmem [resolvable:$true] %s904_s23  ;;  %s925_s5 = int_to_ptr.vmem [resolvable:$true] %s924_s5 }
 0x4ee   :  { %s1401_s24 = scalar_lea.vmem %s905_s23, 128  ;;  %p1406_p7 = scmp.lt.s32.totalorder %s905_s23, %s905_s23 }
 0x4ef   :  { %p1402_p6 = scmp.ne.s32.totalorder %s905_s23, %s1401_s24  ;;  %p1407_p8 = scmp.lt.s32.totalorder %s1401_s24, %s1401_s24 }
 0x4f1   :  { %p1408_p9 = por %p1407_p8, %p1406_p7 }
 0x4f3   :  { %p1409_p10 = pnand %p1408_p9, %p1402_p6 }
 0x4f5   :  { %1412 = shalt.err (!%p1409_p10)
}
 0x4f6   :  { %s1413_s1 = scalar_lea.hbm %s1915_s15, 128 }
 0x4f7   :  { %p1414_p11 = scmp.ne.s32.totalorder %s1915_s15, %s1413_s1  ;;  %p1417_p12 = scmp.lt.u32.totalorder %s1413_s1, %s1915_s15 }
 0x4f9   :  { %p1419_p13 = pnand %p1417_p12, %p1414_p11 }
 0x4fb   :  { %1422 = shalt.err (!%p1419_p13)
}
 0x4fc   :  { %907 = dma.vmem_to_hbm [thread:$0]  %s905_s23, 128, %s1915_s15, [#allocation4]  }
 0x4fd   :  { %s1423_s20 = scalar_lea.vmem %s925_s5, 128  ;;  %p1428_p1 = scmp.lt.s32.totalorder %s925_s5, %s925_s5 }
 0x4fe   :  { %p1424_p0 = scmp.ne.s32.totalorder %s925_s5, %s1423_s20  ;;  %p1429_p2 = scmp.lt.s32.totalorder %s1423_s20, %s1423_s20 }
 0x500   :  { %p1430_p3 = por %p1429_p2, %p1428_p1 }
 0x502   :  { %p1431_p4 = pnand %p1430_p3, %p1424_p0 }
 0x504   :  { %1434 = shalt.err (!%p1431_p4)
}
 0x505   :  { %s1435_s11 = scalar_lea.hbm %s1917_s17, 128 }
 0x506   :  { %p1436_p5 = scmp.ne.s32.totalorder %s1917_s17, %s1435_s11  ;;  %p1439_p6 = scmp.lt.u32.totalorder %s1435_s11, %s1917_s17 }
 0x508   :  { %p1441_p7 = pnand %p1439_p6, %p1436_p5 }
 0x50a   :  { %1444 = shalt.err (!%p1441_p7)
}
 0x50b   :  { %927 = dma.vmem_to_hbm [thread:$0]  %s925_s5, 128, %s1917_s17, [#allocation13]   ;;  %v757_v55 = vld [vmem:[%s1913_s13] sm:$0x3] }
 0x50c   :  { %v762_v56 = vrot.slane %v757_v55, %v377_v5  ;;  %v766_v57 = vrot.slane %v757_v55, %v381_v7  ;;  %s1540_s29 = smov [#allocation15]  }
 0x50d   :  { %s934_s23 = sshll.u32 %s1540_s29, 4  ;;  %s935_s23 = int_to_ptr.vmem [resolvable:$true] %s934_s23 }
 0x50e   :  { %s1445_s17 = scalar_lea.vmem %s935_s23, 128  ;;  %p1450_p9 = scmp.lt.s32.totalorder %s935_s23, %s935_s23 }
 0x50f   :  { %p1446_p8 = scmp.ne.s32.totalorder %s935_s23, %s1445_s17  ;;  %p1451_p10 = scmp.lt.s32.totalorder %s1445_s17, %s1445_s17 }
 0x511   :  { %p1452_p11 = por %p1451_p10, %p1450_p9 }
 0x513   :  { %p1453_p12 = pnand %p1452_p11, %p1446_p8 }
 0x5b6   :  { %v883_v58 = vpop.f32.mrb[8].mxu1 }
 0x5b7   :  { %v884_v59 = vadd.f32 %v883_v58, %v762_v56  ;;  %v885_v60 = vpop.f32.mrb[9].mxu1 }
 0x5b8   :  { %v886_v61 = vadd.f32 %v885_v60, %v766_v57  ;;  %v887_v62 = vpop.f32.mrb[10].mxu1 }
 0x5b9   :  { %895 = vst [vmem:[#allocation15] sm:$0xff] %v884_v59  ;;  %v888_v63 = vpop.f32.mrb[11].mxu1 }
 0x5ba   :  { %v890_v1 = vmul.f32 1.442695, %v886_v61 }
 0x5bb   :  { %1456 = shalt.err (!%p1453_p12)
}
 0x5bc   :  { %s1457_s5 = scalar_lea.hbm %s1918_s18, 128 }
 0x5bd   :  { %p1458_p13 = scmp.ne.s32.totalorder %s1918_s18, %s1457_s5  ;;  %p1461_p0 = scmp.lt.u32.totalorder %s1457_s5, %s1918_s18 }
 0x5bf   :  { %p1463_p1 = pnand %p1461_p0, %p1458_p13 }
 0x5c1   :  { %1466 = shalt.err (!%p1463_p1)
}
 0x5c2   :  { %937 = dma.vmem_to_hbm [thread:$0]  %s935_s23, 128, %s1918_s18, [#allocation16]   ;;  %1267 = vpow2.f32 %v890_v1  ;;  %v892_v2 = vld [vmem:[%s1914_s14] sm:$0xff] }
 0x5c3   :  { %s1541_s16 = smov [#allocation17]   ;;  %s1542_s20 = smov [#allocation18]  }
 0x5c4   :  { %s944_s4 = sshll.u32 %s1541_s16, 4  ;;  %s954_s25 = sshll.u32 %s1542_s20, 4  ;;  %s945_s4 = int_to_ptr.vmem [resolvable:$true] %s944_s4  ;;  %s955_s25 = int_to_ptr.vmem [resolvable:$true] %s954_s25 }
 0x5c5   :  { %s1467_s3 = scalar_lea.vmem %s945_s4, 128  ;;  %p1472_p3 = scmp.lt.s32.totalorder %s945_s4, %s945_s4 }
 0x5c6   :  { %p1468_p2 = scmp.ne.s32.totalorder %s945_s4, %s1467_s3  ;;  %p1473_p4 = scmp.lt.s32.totalorder %s1467_s3, %s1467_s3 }
 0x5c8   :  { %p1474_p5 = por %p1473_p4, %p1472_p3 }
 0x5ca   :  { %p1475_p6 = pnand %p1474_p5, %p1468_p2 }
 0x5cc   :  { %v1268_v3 = vpop.eup %1267 }
 0x5cd   :  { %896 = vst [vmem:[#allocation17] sm:$0xff] %v1268_v3  ;;  %v893_v4 = vmul.f32 %v1268_v3, %v892_v2 }
 0x5ce   :  { %1478 = shalt.err (!%p1475_p6)
}
 0x5cf   :  { %s1479_s26 = scalar_lea.hbm %s1919_s19, 128 }
 0x5d0   :  { %p1480_p7 = scmp.ne.s32.totalorder %s1919_s19, %s1479_s26  ;;  %p1483_p8 = scmp.lt.u32.totalorder %s1479_s26, %s1919_s19 }
 0x5d2   :  { %p1485_p9 = pnand %p1483_p8, %p1480_p7 }
 0x5d4   :  { %1488 = shalt.err (!%p1485_p9)
}
 0x5d5   :  { %947 = dma.vmem_to_hbm [thread:$0]  %s945_s4, 128, %s1919_s19, [#allocation16]   ;;  %v894_v5 = vadd.f32 %v893_v4, %v884_v59 }
 0x5d6   :  { %s1489_s21 = scalar_lea.vmem %s955_s25, 128  ;;  %p1494_p11 = scmp.lt.s32.totalorder %s955_s25, %s955_s25 }
 0x5d7   :  { %897 = vst [vmem:[#allocation18] sm:$0xff] %v894_v5  ;;  %p1490_p10 = scmp.ne.s32.totalorder %s955_s25, %s1489_s21  ;;  %p1495_p12 = scmp.lt.s32.totalorder %s1489_s21, %s1489_s21 }
 0x5d9   :  { %p1496_p13 = por %p1495_p12, %p1494_p11 }
 0x5db   :  { %p1497_p0 = pnand %p1496_p13, %p1490_p10 }
 0x5dd   :  { %1500 = shalt.err (!%p1497_p0)
}
 0x5de   :  { %s1937_s23 = sld [smem:[#allocation32_spill]] }
 0x5e4   :  { %s1501_s17 = scalar_lea.hbm %s1937_s23, 128 }
 0x5e5   :  { %p1502_p1 = scmp.ne.s32.totalorder %s1937_s23, %s1501_s17  ;;  %p1505_p2 = scmp.lt.u32.totalorder %s1501_s17, %s1937_s23 }
 0x5e7   :  { %p1507_p3 = pnand %p1505_p2, %p1502_p1 }
 0x5e9   :  { %1510 = shalt.err (!%p1507_p3)
}
 0x5ea   :  { %957 = dma.vmem_to_hbm [thread:$0]  %s955_s25, 128, %s1937_s23, [#allocation19]  }
 0x5eb   :  { %1517 = dma.done.wait [#allocation4], 128  }
 0x5ec   :  { %1518 = vsyncadd [#allocation4], 4294967168 }
 0x5ed   :  { %1519 = dma.done.wait [#allocation13], 256  }
 0x5ee   :  { %1520 = vsyncadd [#allocation13], 4294967040 }
 0x5ef   :  { %1521 = dma.done.wait [#allocation16], 256  }
 0x5f0   :  { %1522 = vsyncadd [#allocation16], 4294967040 }
 0x5f1   :  { %1523 = dma.done.wait [#allocation19], 128  }
 0x5f2   :  { %1524 = vsyncadd [#allocation19], 4294967168 }
 0x5f3   :  { %976 = vsyncpa [#allocation3], 1 }
 0x5f4   :  { %977 = vsyncpa [#allocation6], 1 }
 0x5f5   :  { %978 = vsyncpa [#allocation9], 1 }
 0x5f6   :  { %979 = vsyncpa [#allocation4], 1 }
 0x5f7   :  { %980 = vsyncpa [#allocation13], 1 }
 0x5f8   :  { %981 = vsyncpa [#allocation16], 1 }
 0x5f9   :  { %982 = vsyncpa [#allocation19], 1 }

// kernel: _vae_forward_impl.1
= control target key start
LH: loop header
LB: loop body
LE: loop exit
PB: predicated region body
PF: predicated region fallthrough
CT: control target
= control target key end

     0   :  { %s1900_s0 = inlined_call_operand.vmem [shape: f32[8,128], index: 0, kind: input, shape index: {}]   ;;  %s1901_s1 = inlined_call_operand.vmem [shape: bf16[128,128], index: 1, kind: input, shape index: {}]   ;;  %s1902_s2 = inlined_call_operand.vmem [shape: f32[1,128], index: 2, kind: input, shape index: {}]   ;;  %s1903_s3 = inlined_call_operand.hbm [shape: bf16[128,128], index: 3, kind: input, shape index: {}]   ;;  %s1904_s4 = inlined_call_operand.vmem [shape: f32[1,128], index: 4, kind: input, shape index: {}]   ;;  %s1905_s5 = inlined_call_operand.hbm [shape: bf16[128,256], index: 5, kind: input, shape index: {}]   ;;  %s1906_s6 = inlined_call_operand.vmem [shape: f32[1,256], index: 6, kind: input, shape index: {}]   ;;  %s1907_s7 = inlined_call_operand.vmem [shape: f32[8,128], index: 7, kind: input, shape index: {}]   ;;  %s1908_s8 = inlined_call_operand.hbm [shape: bf16[128,128], index: 8, kind: input, shape index: {}]   ;;  %s1909_s9 = inlined_call_operand.vmem [shape: f32[1,128], index: 9, kind: input, shape index: {}]   ;;  %s1910_s10 = inlined_call_operand.hbm [shape: bf16[128,128], index: 10, kind: input, shape index: {}]   ;;  %s1911_s11 = inlined_call_operand.vmem [shape: f32[1,128], index: 11, kind: input, shape index: {}]   ;;  %s1912_s12 = inlined_call_operand.hbm [shape: bf16[128,256], index: 12, kind: input, shape index: {}]   ;;  %s1913_s13 = inlined_call_operand.vmem [shape: f32[1,256], index: 13, kind: input, shape index: {}]   ;;  %s1914_s14 = inlined_call_operand.vmem [shape: f32[8,128], index: 14, kind: input, shape index: {}]   ;;  %s1915_s15 = inlined_call_operand.hbm [shape: f32[8,128], index: 15, kind: output, shape index: {0}]   ;;  %s1916_s16 = inlined_call_operand.hbm [shape: f32[8,128], index: 16, kind: output, shape index: {1}]   ;;  %s1917_s17 = inlined_call_operand.hbm [shape: f32[8,128], index: 17, kind: output, shape index: {2}]   ;;  %s1918_s18 = inlined_call_operand.hbm [shape: f32[8,128], index: 18, kind: output, shape index: {3}]   ;;  %s1919_s19 = inlined_call_operand.hbm [shape: f32[8,128], index: 19, kind: output, shape index: {4}]   ;;  %s1920_s20 = inlined_call_operand.hbm [shape: f32[8,128], index: 20, kind: output, shape index: {5}]  }
   0x1   :  { %1925 = sst [smem:[#allocation27_spill]] %s1900_s0 }
   0x2   :  { %1926 = sst [smem:[#allocation28_spill]] %s1901_s1 }
   0x3   :  { %1927 = sst [smem:[#allocation29_spill]] %s1902_s2 }
   0x4   :  { %1928 = sst [smem:[#allocation30_spill]] %s1903_s3 }
   0x5   :  { %1929 = sst [smem:[#allocation31_spill]] %s1904_s4 }
   0x6   :  { %1930 = sst [smem:[#allocation32_spill]] %s1920_s20 }
   0x7   :  { %26 = vsyncpa [#allocation3], 0 }
   0x8   :  { %27 = vsyncpa [#allocation6], 0 }
   0x9   :  { %28 = vsyncpa [#allocation9], 0 }
   0xa   :  { %29 = vsyncpa [#allocation4], 0 }
   0xb   :  { %30 = vsyncpa [#allocation13], 0 }
   0xc   :  { %31 = vsyncpa [#allocation16], 0 }
   0xd   :  { %32 = vsyncpa [#allocation19], 0  ;;  %s1525_s1 = smov [#allocation5]   ;;  %s1269_s2 = scalar_lea.hbm %s1905_s5, 2048 }
   0xe   :  { %s58_s22 = sshll.u32 %s1525_s1, 4  ;;  %p1270_p0 = scmp.ne.s32.totalorder %s1905_s5, %s1269_s2  ;;  %s59_s22 = int_to_ptr.vmem [resolvable:$true] %s58_s22 }
   0xf   :  { %p1273_p1 = scmp.lt.u32.totalorder %s1269_s2, %s1905_s5 }
  0x11   :  { %p1275_p2 = pnand %p1273_p1, %p1270_p0 }
  0x13   :  { %1278 = shalt.err (!%p1275_p2)
}
  0x14   :  { %s1279_s28 = scalar_lea.vmem %s59_s22, 2048  ;;  %p1284_p4 = scmp.lt.s32.totalorder %s59_s22, %s59_s22 }
  0x15   :  { %p1280_p3 = scmp.ne.s32.totalorder %s59_s22, %s1279_s28  ;;  %p1285_p5 = scmp.lt.s32.totalorder %s1279_s28, %s1279_s28 }
  0x17   :  { %p1286_p6 = por %p1285_p5, %p1284_p4 }
  0x19   :  { %p1287_p7 = pnand %p1286_p6, %p1280_p3 }
  0x1b   :  { %1290 = shalt.err (!%p1287_p7)
}
  0x1c   :  { %s1924_s4 = smov 128   ;;  %s1527_s29 = smov 8  }
  0x1d   :  { %64 = dma.hbm_to_vmem [thread:$0]  %s1905_s5, 2048, %s59_s22, [#allocation6], %s1924_s4, %s1924_s4, %s1527_s29  }
  0x1e   :  { %s1528_s21 = smov [#allocation8]   ;;  %s1529_s23 = smov [#allocation2]  }
  0x1f   :  { %s88_s1 = sshll.u32 %s1528_s21, 4  ;;  %s44_s24 = sshll.u32 %s1529_s23, 4  ;;  %s89_s1 = int_to_ptr.vmem [resolvable:$true] %s88_s1  ;;  %s45_s24 = int_to_ptr.vmem [resolvable:$true] %s44_s24 }
  0x20   :  { %s1291_s3 = scalar_lea.hbm %s1910_s10, 1024 }
  0x21   :  { %p1292_p8 = scmp.ne.s32.totalorder %s1910_s10, %s1291_s3  ;;  %p1295_p9 = scmp.lt.u32.totalorder %s1291_s3, %s1910_s10 }
  0x23   :  { %p1297_p10 = pnand %p1295_p9, %p1292_p8 }
  0x25   :  { %1300 = shalt.err (!%p1297_p10)
}
  0x26   :  { %s1301_s5 = scalar_lea.vmem %s89_s1, 1024  ;;  %p1306_p12 = scmp.lt.s32.totalorder %s89_s1, %s89_s1 }
  0x27   :  { %p1302_p11 = scmp.ne.s32.totalorder %s89_s1, %s1301_s5  ;;  %p1307_p13 = scmp.lt.s32.totalorder %s1301_s5, %s1301_s5 }
  0x29   :  { %p1308_p0 = por %p1307_p13, %p1306_p12 }
  0x2b   :  { %p1309_p1 = pnand %p1308_p0, %p1302_p11 }
  0x2d   :  { %1312 = shalt.err (!%p1309_p1)
}
  0x2e   :  { %s1530_s22 = smov 64   ;;  %s1531_s30 = smov 4  }
  0x2f   :  { %94 = dma.hbm_to_vmem [thread:$0]  %s1910_s10, 1024, %s89_s1, [#allocation9], %s1530_s22, %s1530_s22, %s1531_s30  }
  0x30   :  { %s1931_s2 = sld [smem:[#allocation30_spill]] }
  0x36   :  { %s1313_s25 = scalar_lea.hbm %s1931_s2, 1024 }
  0x37   :  { %p1314_p2 = scmp.ne.s32.totalorder %s1931_s2, %s1313_s25  ;;  %p1317_p3 = scmp.lt.u32.totalorder %s1313_s25, %s1931_s2 }
  0x39   :  { %p1319_p4 = pnand %p1317_p3, %p1314_p2 }
  0x3b   :  { %1322 = shalt.err (!%p1319_p4)
}
  0x3c   :  { %s1323_s5 = scalar_lea.vmem %s45_s24, 1024  ;;  %p1328_p6 = scmp.lt.s32.totalorder %s45_s24, %s45_s24 }
  0x3d   :  { %p1324_p5 = scmp.ne.s32.totalorder %s45_s24, %s1323_s5  ;;  %p1329_p7 = scmp.lt.s32.totalorder %s1323_s5, %s1323_s5 }
  0x3f   :  { %p1330_p8 = por %p1329_p7, %p1328_p6 }
  0x41   :  { %p1331_p9 = pnand %p1330_p8, %p1324_p5 }
  0x43   :  { %1334 = shalt.err (!%p1331_p9)
}
  0x44   :  { %50 = dma.hbm_to_vmem [thread:$0]  %s1931_s2, 1024, %s45_s24, [#allocation3], %s1530_s22, %s1530_s22, %s1531_s30  }
  0x45   :  { %s1532_s0 = smov [#allocation7]   ;;  %s1533_s20 = smov [#allocation10]  }
  0x46   :  { %s74_s21 = sshll.u32 %s1532_s0, 4  ;;  %s102_s23 = sshll.u32 %s1533_s20, 4  ;;  %s75_s21 = int_to_ptr.vmem [resolvable:$true] %s74_s21  ;;  %s103_s23 = int_to_ptr.vmem [resolvable:$true] %s102_s23 }
  0x47   :  { %s1335_s26 = scalar_lea.hbm %s1908_s8, 1024 }
  0x48   :  { %p1336_p10 = scmp.ne.s32.totalorder %s1908_s8, %s1335_s26  ;;  %p1339_p11 = scmp.lt.u32.totalorder %s1335_s26, %s1908_s8 }
  0x4a   :  { %p1341_p12 = pnand %p1339_p11, %p1336_p10 }
  0x4c   :  { %1344 = shalt.err (!%p1341_p12)
}
  0x4d   :  { %s1345_s24 = scalar_lea.vmem %s75_s21, 1024  ;;  %p1350_p0 = scmp.lt.s32.totalorder %s75_s21, %s75_s21 }
  0x4e   :  { %p1346_p13 = scmp.ne.s32.totalorder %s75_s21, %s1345_s24  ;;  %p1351_p1 = scmp.lt.s32.totalorder %s1345_s24, %s1345_s24 }
  0x50   :  { %p1352_p2 = por %p1351_p1, %p1350_p0 }
  0x52   :  { %p1353_p3 = pnand %p1352_p2, %p1346_p13 }
  0x54   :  { %1356 = shalt.err (!%p1353_p3)
}
  0x55   :  { %80 = dma.hbm_to_vmem [thread:$0]  %s1908_s8, 1024, %s75_s21, [#allocation6], %s1530_s22, %s1530_s22, %s1531_s30  }
  0x56   :  { %s1357_s0 = scalar_lea.hbm %s1912_s12, 2048 }
  0x57   :  { %p1358_p4 = scmp.ne.s32.totalorder %s1912_s12, %s1357_s0  ;;  %p1361_p5 = scmp.lt.u32.totalorder %s1357_s0, %s1912_s12 }
  0x59   :  { %p1363_p6 = pnand %p1361_p5, %p1358_p4 }
  0x5b   :  { %1366 = shalt.err (!%p1363_p6)
}
  0x5c   :  { %s1367_s27 = scalar_lea.vmem %s103_s23, 2048  ;;  %p1372_p8 = scmp.lt.s32.totalorder %s103_s23, %s103_s23 }
  0x5d   :  { %p1368_p7 = scmp.ne.s32.totalorder %s103_s23, %s1367_s27  ;;  %p1373_p9 = scmp.lt.s32.totalorder %s1367_s27, %s1367_s27 }
  0x5f   :  { %p1374_p10 = por %p1373_p9, %p1372_p8 }
  0x61   :  { %p1375_p11 = pnand %p1374_p10, %p1368_p7 }
  0x63   :  { %1378 = shalt.err (!%p1375_p11)
}
  0x64   :  { %s1932_s8 = smov 128  }
  0x65   :  { %108 = dma.hbm_to_vmem [thread:$0]  %s1912_s12, 2048, %s103_s23, [#allocation9], %s1932_s8, %s1932_s8, %s1527_s29  }
  0x66   :  { %1511 = dma.done.wait [#allocation3], 1024  }
  0x67   :  { %1512 = vsyncadd [#allocation3], 4294966272 }
  0x68   :  { %1513 = dma.done.wait [#allocation6], 3072  }
  0x69   :  { %1514 = vsyncadd [#allocation6], 4294964224 }
  0x6a   :  { %1515 = dma.done.wait [#allocation9], 3072  }
  0x6b   :  { %1516 = vsyncadd [#allocation9], 4294964224  ;;  %v1534_v0 = vmov 0.0   ;;  %vm1535_vm0 = vmmov 0   ;;  %s1933_s29 = sld [smem:[#allocation28_spill]]  ;;  %v1193_v4 = vld [vmem:[#allocation2] sm:$0xff]  }
  0x6c   :  { %1087 = vmatprep.subr.bf16.mxu0 %v1534_v0  ;;  %1103 = vmatprep.mubr.msk.bf16.mxu0 %vm1535_vm0, %v1534_v0  ;;  %v1194_v6 = vld [vmem:[#allocation2 + $0x8] sm:$0xff]   ;;  %v1195_v8 = vld [vmem:[#allocation2 + $0x10] sm:$0xff]   ;;  %v1196_v10 = vld [vmem:[#allocation2 + $0x18] sm:$0xff]   ;;  %s1934_s30 = sld [smem:[#allocation27_spill]]  ;;  %v1536_v43 = vmov 0   ;;  %s1936_s5 = sld [smem:[#allocation31_spill]] }
  0x6d   :  { %1107 = vmatprep.subr.bf16.mxu1 %v1534_v0  ;;  %1123 = vmatprep.mubr.msk.bf16.mxu1 %vm1535_vm0, %v1534_v0  ;;  %v1197_v12 = vld [vmem:[#allocation2 + $0x20] sm:$0xff]   ;;  %v1198_v15 = vld [vmem:[#allocation2 + $0x28] sm:$0xff]   ;;  %v1199_v17 = vld [vmem:[#allocation2 + $0x30] sm:$0xff]  }
  0x6e   :  { %1108 = vmatpush3.bf16.msra.mxu1 %v1193_v4  ;;  %v1200_v18 = vld [vmem:[#allocation2 + $0x38] sm:$0xff]   ;;  %v1201_v19 = vld [vmem:[#allocation5] ss:$8 sps:$4 sm:$0xff]   ;;  %v1203_v20 = vld [vmem:[#allocation5 + $0x4] ss:$8 sps:$4 sm:$0xff]  }
  0x6f   :  { %1109 = vmatprep.subr.bf16.mxu1 %v1534_v0  ;;  %v1206_v21 = vld [vmem:[#allocation5 + $0x14] ss:$8 sps:$4 sm:$0xff]   ;;  %v1204_v22 = vld [vmem:[#allocation5 + $0x10] ss:$8 sps:$4 sm:$0xff]   ;;  %v1209_v23 = vld [vmem:[#allocation5 + $0x24] ss:$8 sps:$4 sm:$0xff]  }
  0x70   :  { %v1207_v24 = vld [vmem:[#allocation5 + $0x20] ss:$8 sps:$4 sm:$0xff]   ;;  %v1212_v25 = vld [vmem:[#allocation5 + $0x34] ss:$8 sps:$4 sm:$0xff]   ;;  %v1210_v26 = vld [vmem:[#allocation5 + $0x30] ss:$8 sps:$4 sm:$0xff]  }
  0x71   :  { %v1185_v1 = vld [vmem:[%s1933_s29] sm:$0xff]   ;;  %v1186_v2 = vld [vmem:[%s1933_s29 + $0x8] sm:$0xff]   ;;  %v1187_v3 = vld [vmem:[%s1933_s29 + $0x10] sm:$0xff]  }
  0x72   :  { %1088 = vmatpush3.bf16.msra.mxu0 %v1185_v1  ;;  %v1188_v5 = vld [vmem:[%s1933_s29 + $0x18] sm:$0xff]   ;;  %v1189_v7 = vld [vmem:[%s1933_s29 + $0x20] sm:$0xff]   ;;  %1110 = vmatpush3.bf16.msra.mxu1 %v1194_v6  ;;  %v1190_v9 = vld [vmem:[%s1933_s29 + $0x28] sm:$0xff]  }
  0x73   :  { %1089 = vmatprep.subr.bf16.mxu0 %v1534_v0  ;;  %1111 = vmatprep.subr.bf16.mxu1 %v1534_v0  ;;  %v1191_v11 = vld [vmem:[%s1933_s29 + $0x30] sm:$0xff]   ;;  %v1192_v13 = vld [vmem:[%s1933_s29 + $0x38] sm:$0xff]   ;;  %v129_v14 = vld [vmem:[%s1934_s30] sm:$0xff]  ;;  %s1935_s29 = sld [smem:[#allocation29_spill]] }
  0x74   :  { %v130_v16 = vpack.c.bf16 %v129_v14, %v129_v14  ;;  %v1215_v27 = vld [vmem:[#allocation5 + $0x44] ss:$8 sps:$4 sm:$0xff]   ;;  %v1213_v28 = vld [vmem:[#allocation5 + $0x40] ss:$8 sps:$4 sm:$0xff]   ;;  %v1218_v29 = vld [vmem:[#allocation5 + $0x54] ss:$8 sps:$4 sm:$0xff]  }
  0x75   :  { %v1216_v30 = vld [vmem:[#allocation5 + $0x50] ss:$8 sps:$4 sm:$0xff]   ;;  %v1221_v31 = vld [vmem:[#allocation5 + $0x64] ss:$8 sps:$4 sm:$0xff]   ;;  %v1219_v32 = vld [vmem:[#allocation5 + $0x60] ss:$8 sps:$4 sm:$0xff]  }
  0x76   :  { %1090 = vmatpush3.bf16.msra.mxu0 %v1186_v2  ;;  %1112 = vmatpush3.bf16.msra.mxu1 %v1195_v8  ;;  %v1224_v41 = vld [vmem:[#allocation5 + $0x74] ss:$8 sps:$4 sm:$0xff]   ;;  %v1222_v42 = vld [vmem:[#allocation5 + $0x70] ss:$8 sps:$4 sm:$0xff]   ;;  %v1225_v44 = vld [vmem:[#allocation7] sm:$0xff]  }
  0x77   :  { %1091 = vmatprep.subr.bf16.mxu0 %v1534_v0  ;;  %1113 = vmatprep.subr.bf16.mxu1 %v1534_v0  ;;  %v1226_v45 = vld [vmem:[#allocation7 + $0x8] sm:$0xff]   ;;  %v992_v46 = vld [vmem:[%s1936_s5] ss:$0 sm:$0xff]  ;;  %v1227_v54 = vld [vmem:[#allocation7 + $0x10] sm:$0xff]  }
  0x78   :  { %v1228_v55 = vld [vmem:[#allocation7 + $0x18] sm:$0xff]   ;;  %v1229_v56 = vld [vmem:[#allocation7 + $0x20] sm:$0xff]   ;;  %v1230_v57 = vld [vmem:[#allocation7 + $0x28] sm:$0xff]  }
  0x79   :  { %v983_v33 = vld [vmem:[%s1935_s29] ss:$0 sm:$0xff]  ;;  %v1231_v58 = vld [vmem:[#allocation7 + $0x30] sm:$0xff]   ;;  %v1232_v59 = vld [vmem:[#allocation7 + $0x38] sm:$0xff]  }
  0x7a   :  { %1092 = vmatpush3.bf16.msra.mxu0 %v1187_v3  ;;  %1114 = vmatpush3.bf16.msra.mxu1 %v1196_v10  ;;  %v1233_v60 = vld [vmem:[#allocation8] sm:$0xff]   ;;  %v1234_v61 = vld [vmem:[#allocation8 + $0x8] sm:$0xff]   ;;  %v1235_v62 = vld [vmem:[#allocation8 + $0x10] sm:$0xff]   ;;  %v375_v3 = vlaneseq }
  0x7b   :  { %1093 = vmatprep.subr.bf16.mxu0 %v1534_v0  ;;  %1115 = vmatprep.subr.bf16.mxu1 %v1534_v0  ;;  %v1236_v63 = vld [vmem:[#allocation8 + $0x18] sm:$0xff]   ;;  %v1237_v1 = vld [vmem:[#allocation8 + $0x20] sm:$0xff]   ;;  %v1238_v2 = vld [vmem:[#allocation8 + $0x28] sm:$0xff]  }
  0x7c   :  { %v1796_v4 = vshrl.u32 %v375_v3, 7  ;;  %v373_v6 = vld [vmem:[%s1906_s6] sm:$0x3] }
  0x7e   :  { %1094 = vmatpush3.bf16.msra.mxu0 %v1188_v5  ;;  %1116 = vmatpush3.bf16.msra.mxu1 %v1197_v12  ;;  %v377_v5 = vsub.s32 0, %v1796_v4 }
  0x7f   :  { %1095 = vmatprep.subr.bf16.mxu0 %v1534_v0  ;;  %1117 = vmatprep.subr.bf16.mxu1 %v1534_v0 }
  0x80   :  { %v378_v8 = vrot.slane %v373_v6, %v377_v5 }
  0x82   :  { %1096 = vmatpush3.bf16.msra.mxu0 %v1189_v7  ;;  %1118 = vmatpush3.bf16.msra.mxu1 %v1198_v15  ;;  %v381_v7 = vsub.s32 1, %v1796_v4 }
  0x83   :  { %1097 = vmatprep.subr.bf16.mxu0 %v1534_v0  ;;  %1119 = vmatprep.subr.bf16.mxu1 %v1534_v0 }
  0x86   :  { %1098 = vmatpush3.bf16.msra.mxu0 %v1190_v9  ;;  %1120 = vmatpush3.bf16.msra.mxu1 %v1199_v17  ;;  %v382_v9 = vrot.slane %v373_v6, %v381_v7  ;;  %v508_v17 = vld [vmem:[%s1907_s7] sm:$0xff] }
  0x87   :  { %1099 = vmatprep.subr.bf16.mxu0 %v1534_v0  ;;  %1121 = vmatprep.subr.bf16.mxu1 %v1534_v0 }
  0x8a   :  { %1100 = vmatpush3.bf16.msra.mxu0 %v1191_v11  ;;  %1122 = vmatpush3.bf16.msra.mxu1 %v1200_v18 }
  0x8b   :  { %1101 = vmatprep.subr.bf16.mxu0 %v1534_v0  ;;  %1127 = vmatprep.subr.bf16.mxu1 %v1534_v0 }
  0x8e   :  { %1102 = vmatpush3.bf16.msra.mxu0 %v1192_v13 }
  0x8f   :  { %465 = vmatprep.subr.bf16.mxu0 %v1203_v20 }
  0x91   :  { %1104 = vmatmul.mubr.bf16.vlgmr.msra.gmra.mrb[0].mxu0 %v130_v16 }
  0x92   :  { %466 = vmatpush1.bf16.msra.mxu0 %v1201_v19  ;;  %497 = vmatprep.mubr.bf16.mxu0 %v1536_v43 }
  0x93   :  { %467 = vmatprep.subr.bf16.mxu0 %v1206_v21 }
  0x96   :  { %468 = vmatpush1.bf16.msra.mxu0 %v1204_v22  ;;  %v1239_v22 = vld [vmem:[#allocation8 + $0x30] sm:$0xff]  }
  0x97   :  { %469 = vmatprep.subr.bf16.mxu0 %v1209_v23  ;;  %v1240_v23 = vld [vmem:[#allocation8 + $0x38] sm:$0xff]  }
  0x9a   :  { %470 = vmatpush1.bf16.msra.mxu0 %v1207_v24  ;;  %v1241_v24 = vld [vmem:[#allocation10] ss:$8 sps:$4 sm:$0xff]  }
  0x9b   :  { %471 = vmatprep.subr.bf16.mxu0 %v1212_v25  ;;  %v1243_v25 = vld [vmem:[#allocation10 + $0x4] ss:$8 sps:$4 sm:$0xff]  }
  0x9e   :  { %472 = vmatpush1.bf16.msra.mxu0 %v1210_v26  ;;  %v1246_v26 = vld [vmem:[#allocation10 + $0x14] ss:$8 sps:$4 sm:$0xff]  }
  0x9f   :  { %473 = vmatprep.subr.bf16.mxu0 %v1215_v27  ;;  %v1244_v27 = vld [vmem:[#allocation10 + $0x10] ss:$8 sps:$4 sm:$0xff]  }
  0xa2   :  { %474 = vmatpush1.bf16.msra.mxu0 %v1213_v28  ;;  %v1249_v28 = vld [vmem:[#allocation10 + $0x24] ss:$8 sps:$4 sm:$0xff]  }
  0xa3   :  { %475 = vmatprep.subr.bf16.mxu0 %v1218_v29  ;;  %v1247_v29 = vld [vmem:[#allocation10 + $0x20] ss:$8 sps:$4 sm:$0xff]  }
  0xa6   :  { %476 = vmatpush1.bf16.msra.mxu0 %v1216_v30  ;;  %v1252_v30 = vld [vmem:[#allocation10 + $0x34] ss:$8 sps:$4 sm:$0xff]  }
  0xa7   :  { %477 = vmatprep.subr.bf16.mxu0 %v1221_v31  ;;  %v1250_v31 = vld [vmem:[#allocation10 + $0x30] ss:$8 sps:$4 sm:$0xff]  }
  0xaa   :  { %478 = vmatpush1.bf16.msra.mxu0 %v1219_v32  ;;  %v1255_v32 = vld [vmem:[#allocation10 + $0x44] ss:$8 sps:$4 sm:$0xff]  }
  0xab   :  { %479 = vmatprep.subr.bf16.mxu0 %v1224_v41 }
  0xae   :  { %480 = vmatpush1.bf16.msra.mxu0 %v1222_v42 }
  0xaf   :  { %1147 = vmatprep.subr.bf16.mxu0 %v1534_v0 }
 0x164   :  { %v236_v34 = vpop.f32.mrb[0].mxu0 }
 0x165   :  { %v237_v35 = vadd.f32 %v983_v33, %v236_v34  ;;  %v1105_v36 = vpop.f32.mrb[1].mxu0  ;;  %v1258_v33 = vld [vmem:[#allocation10 + $0x54] ss:$8 sps:$4 sm:$0xff]   ;;  %v1256_v34 = vld [vmem:[#allocation10 + $0x50] ss:$8 sps:$4 sm:$0xff]  }
 0x166   :  { %v239_v37 = vpop.f32.mrb[2].mxu0  ;;  %v1259_v36 = vld [vmem:[#allocation10 + $0x60] ss:$8 sps:$4 sm:$0xff]  }
 0x167   :  { %v242_v38 = vmax.f32 %v237_v35, 0.0  ;;  %v1106_v39 = vpop.f32.mrb[3].mxu0  ;;  %v1261_v35 = vld [vmem:[#allocation10 + $0x64] ss:$8 sps:$4 sm:$0xff]   ;;  %v1017_v37 = vld [vmem:[%s1909_s9] ss:$0 sm:$0xff] }
 0x168   :  { %s1537_s9 = smov [#allocation12]  }
 0x169   :  { %v243_v40 = vpack.c.bf16 %v242_v38, %v242_v38  ;;  %s914_s20 = sshll.u32 %s1537_s9, 4  ;;  %s915_s20 = int_to_ptr.vmem [resolvable:$true] %s914_s20 }
 0x16a   :  { %s1379_s25 = scalar_lea.vmem %s915_s20, 128  ;;  %p1384_p13 = scmp.lt.s32.totalorder %s915_s20, %s915_s20 }
 0x16b   :  { %1124 = vmatmul.mubr.bf16.vlgmr.msra.gmra.mrb[0].mxu1 %v243_v40  ;;  %p1380_p12 = scmp.ne.s32.totalorder %s915_s20, %s1379_s25  ;;  %p1385_p0 = scmp.lt.s32.totalorder %s1379_s25, %s1379_s25 }
 0x16c   :  { %1143 = vmatprep.mubr.msk.bf16.mxu1 %vm1535_vm0, %v1534_v0  ;;  %1128 = vmatpush3.bf16.msra.mxu1 %v1225_v44 }
 0x16d   :  { %1129 = vmatprep.subr.bf16.mxu1 %v1534_v0  ;;  %p1386_p1 = por %p1385_p0, %p1384_p13 }
 0x16f   :  { %p1387_p2 = pnand %p1386_p1, %p1380_p12 }
 0x170   :  { %1130 = vmatpush3.bf16.msra.mxu1 %v1226_v45  ;;  %v1264_v45 = vld [vmem:[#allocation10 + $0x74] ss:$8 sps:$4 sm:$0xff]  }
 0x171   :  { %1131 = vmatprep.subr.bf16.mxu1 %v1534_v0 }
 0x174   :  { %1132 = vmatpush3.bf16.msra.mxu1 %v1227_v54 }
 0x175   :  { %1133 = vmatprep.subr.bf16.mxu1 %v1534_v0 }
 0x178   :  { %1134 = vmatpush3.bf16.msra.mxu1 %v1228_v55 }
 0x179   :  { %1135 = vmatprep.subr.bf16.mxu1 %v1534_v0 }
 0x17c   :  { %1136 = vmatpush3.bf16.msra.mxu1 %v1229_v56 }
 0x17d   :  { %1137 = vmatprep.subr.bf16.mxu1 %v1534_v0 }
 0x180   :  { %1138 = vmatpush3.bf16.msra.mxu1 %v1230_v57 }
 0x181   :  { %1139 = vmatprep.subr.bf16.mxu1 %v1534_v0 }
 0x184   :  { %1140 = vmatpush3.bf16.msra.mxu1 %v1231_v58 }
 0x185   :  { %1141 = vmatprep.subr.bf16.mxu1 %v1534_v0 }
 0x188   :  { %1142 = vmatpush3.bf16.msra.mxu1 %v1232_v59 }
 0x189   :  { %849 = vmatprep.subr.bf16.mxu1 %v1243_v25 }
 0x23e   :  { %v349_v47 = vpop.f32.mrb[0].mxu1 }
 0x23f   :  { %v350_v48 = vadd.f32 %v992_v46, %v349_v47  ;;  %v1125_v49 = vpop.f32.mrb[1].mxu1  ;;  %v1262_v46 = vld [vmem:[#allocation10 + $0x70] ss:$8 sps:$4 sm:$0xff]   ;;  %v1026_v47 = vld [vmem:[%s1911_s11] ss:$0 sm:$0xff] }
 0x240   :  { %v352_v50 = vpop.f32.mrb[2].mxu1 }
 0x241   :  { %v355_v51 = vmax.f32 %v350_v48, 0.0  ;;  %v1126_v52 = vpop.f32.mrb[3].mxu1 }
 0x243   :  { %v356_v53 = vpack.c.bf16 %v355_v51, %v355_v51 }
 0x245   :  { %498 = vmatmul.mubr.bf16.vlgmr.msra.gmra.mrb[4].mxu0 %v356_v53 }
 0x246   :  { %1163 = vmatprep.mubr.msk.bf16.mxu0 %vm1535_vm0, %v1534_v0  ;;  %1148 = vmatpush3.bf16.msra.mxu0 %v1233_v60 }
 0x247   :  { %1149 = vmatprep.subr.bf16.mxu0 %v1534_v0 }
 0x24a   :  { %1150 = vmatpush3.bf16.msra.mxu0 %v1234_v61 }
 0x24b   :  { %1151 = vmatprep.subr.bf16.mxu0 %v1534_v0 }
 0x24e   :  { %1152 = vmatpush3.bf16.msra.mxu0 %v1235_v62 }
 0x24f   :  { %1153 = vmatprep.subr.bf16.mxu0 %v1534_v0 }
 0x252   :  { %1154 = vmatpush3.bf16.msra.mxu0 %v1236_v63 }
 0x253   :  { %1155 = vmatprep.subr.bf16.mxu0 %v1534_v0 }
 0x256   :  { %1156 = vmatpush3.bf16.msra.mxu0 %v1237_v1 }
 0x257   :  { %1157 = vmatprep.subr.bf16.mxu0 %v1534_v0 }
 0x25a   :  { %1158 = vmatpush3.bf16.msra.mxu0 %v1238_v2 }
 0x25b   :  { %1159 = vmatprep.subr.bf16.mxu0 %v1534_v0 }
 0x25e   :  { %1160 = vmatpush3.bf16.msra.mxu0 %v1239_v22 }
 0x25f   :  { %1161 = vmatprep.subr.bf16.mxu0 %v1534_v0  ;;  %v1253_v0 = vld [vmem:[#allocation10 + $0x40] ss:$8 sps:$4 sm:$0xff]  }
 0x262   :  { %1162 = vmatpush3.bf16.msra.mxu0 %v1240_v23 }
 0x318   :  { %v499_v10 = vpop.f32.mrb[4].mxu0 }
 0x319   :  { %v500_v11 = vadd.f32 %v499_v10, %v378_v8  ;;  %v501_v12 = vpop.f32.mrb[5].mxu0 }
 0x31a   :  { %v502_v13 = vadd.f32 %v501_v12, %v382_v9  ;;  %v503_v14 = vpop.f32.mrb[6].mxu0 }
 0x31b   :  { %511 = vst [vmem:[#allocation11] sm:$0xff] %v500_v11  ;;  %v504_v15 = vpop.f32.mrb[7].mxu0 }
 0x31c   :  { %v506_v16 = vmul.f32 1.442695, %v502_v13 }
 0x31e   :  { %1265 = vpow2.f32 %v506_v16 }
 0x328   :  { %v1266_v18 = vpop.eup %1265 }
 0x329   :  { %512 = vst [vmem:[#allocation12] sm:$0xff] %v1266_v18  ;;  %v509_v19 = vmul.f32 %v1266_v18, %v508_v17 }
 0x32b   :  { %v510_v20 = vadd.f32 %v509_v19, %v500_v11 }
 0x32d   :  { %v514_v21 = vpack.c.bf16 %v510_v20, %v510_v20  ;;  %513 = vst [vmem:[#allocation14] sm:$0xff] %v510_v20 }
 0x32f   :  { %1144 = vmatmul.mubr.bf16.vlgmr.msra.gmra.mrb[4].mxu1 %v514_v21 }
 0x330   :  { %881 = vmatprep.mubr.bf16.mxu1 %v1536_v43  ;;  %850 = vmatpush1.bf16.msra.mxu1 %v1241_v24 }
 0x331   :  { %851 = vmatprep.subr.bf16.mxu1 %v1246_v26 }
 0x334   :  { %852 = vmatpush1.bf16.msra.mxu1 %v1244_v27 }
 0x335   :  { %853 = vmatprep.subr.bf16.mxu1 %v1249_v28 }
 0x338   :  { %854 = vmatpush1.bf16.msra.mxu1 %v1247_v29 }
 0x339   :  { %855 = vmatprep.subr.bf16.mxu1 %v1252_v30 }
 0x33c   :  { %856 = vmatpush1.bf16.msra.mxu1 %v1250_v31 }
 0x33d   :  { %857 = vmatprep.subr.bf16.mxu1 %v1255_v32 }
 0x340   :  { %858 = vmatpush1.bf16.msra.mxu1 %v1253_v0 }
 0x341   :  { %859 = vmatprep.subr.bf16.mxu1 %v1258_v33 }
 0x344   :  { %860 = vmatpush1.bf16.msra.mxu1 %v1256_v34 }
 0x345   :  { %861 = vmatprep.subr.bf16.mxu1 %v1261_v35 }
 0x348   :  { %862 = vmatpush1.bf16.msra.mxu1 %v1259_v36 }
 0x349   :  { %863 = vmatprep.subr.bf16.mxu1 %v1264_v45 }
 0x34c   :  { %864 = vmatpush1.bf16.msra.mxu1 %v1262_v46 }
 0x402   :  { %v620_v38 = vpop.f32.mrb[4].mxu1 }
 0x403   :  { %v621_v39 = vadd.f32 %v1017_v37, %v620_v38  ;;  %v1145_v40 = vpop.f32.mrb[5].mxu1 }
 0x404   :  { %v623_v41 = vpop.f32.mrb[6].mxu1 }
 0x405   :  { %v626_v42 = vmax.f32 %v621_v39, 0.0  ;;  %v1146_v43 = vpop.f32.mrb[7].mxu1 }
 0x407   :  { %v627_v44 = vpack.c.bf16 %v626_v42, %v626_v42 }
 0x409   :  { %1164 = vmatmul.mubr.bf16.vlgmr.msra.gmra.mrb[8].mxu0 %v627_v44 }
 0x4dc   :  { %v733_v48 = vpop.f32.mrb[8].mxu0 }
 0x4dd   :  { %v734_v49 = vadd.f32 %v1026_v47, %v733_v48  ;;  %v1165_v50 = vpop.f32.mrb[9].mxu0 }
 0x4de   :  { %v736_v51 = vpop.f32.mrb[10].mxu0 }
 0x4df   :  { %v739_v52 = vmax.f32 %v734_v49, 0.0  ;;  %v1166_v53 = vpop.f32.mrb[11].mxu0 }
 0x4e1   :  { %v740_v54 = vpack.c.bf16 %v739_v52, %v739_v52 }
 0x4e3   :  { %882 = vmatmul.mubr.bf16.vlgmr.msra.gmra.mrb[8].mxu1 %v740_v54 }
 0x4e4   :  { %1390 = shalt.err (!%p1387_p2)
}
 0x4e5   :  { %s1391_s26 = scalar_lea.hbm %s1916_s16, 128 }
 0x4e6   :  { %p1392_p3 = scmp.ne.s32.totalorder %s1916_s16, %s1391_s26  ;;  %p1395_p4 = scmp.lt.u32.totalorder %s1391_s26, %s1916_s16 }
 0x4e8   :  { %p1397_p5 = pnand %p1395_p4, %p1392_p3 }
 0x4ea   :  { %1400 = shalt.err (!%p1397_p5)
}
 0x4eb   :  { %917 = dma.vmem_to_hbm [thread:$0]  %s915_s20, 128, %s1916_s16, [#allocation13]  }
 0x4ec   :  { %s1538_s29 = smov [#allocation11]   ;;  %s1539_s28 = smov [#allocation14]  }
 0x4ed   :  { %s904_s23 = sshll.u32 %s1538_s29, 4  ;;  %s924_s5 = sshll.u32 %s1539_s28, 4  ;;  %s905_s23 = int_to_ptr.vmem [resolvable:$true] %s904_s23  ;;  %s925_s5 = int_to_ptr.vmem [resolvable:$true] %s924_s5 }
 0x4ee   :  { %s1401_s24 = scalar_lea.vmem %s905_s23, 128  ;;  %p1406_p7 = scmp.lt.s32.totalorder %s905_s23, %s905_s23 }
 0x4ef   :  { %p1402_p6 = scmp.ne.s32.totalorder %s905_s23, %s1401_s24  ;;  %p1407_p8 = scmp.lt.s32.totalorder %s1401_s24, %s1401_s24 }
 0x4f1   :  { %p1408_p9 = por %p1407_p8, %p1406_p7 }
 0x4f3   :  { %p1409_p10 = pnand %p1408_p9, %p1402_p6 }
 0x4f5   :  { %1412 = shalt.err (!%p1409_p10)
}
 0x4f6   :  { %s1413_s1 = scalar_lea.hbm %s1915_s15, 128 }
 0x4f7   :  { %p1414_p11 = scmp.ne.s32.totalorder %s1915_s15, %s1413_s1  ;;  %p1417_p12 = scmp.lt.u32.totalorder %s1413_s1, %s1915_s15 }
 0x4f9   :  { %p1419_p13 = pnand %p1417_p12, %p1414_p11 }
 0x4fb   :  { %1422 = shalt.err (!%p1419_p13)
}
 0x4fc   :  { %907 = dma.vmem_to_hbm [thread:$0]  %s905_s23, 128, %s1915_s15, [#allocation4]  }
 0x4fd   :  { %s1423_s20 = scalar_lea.vmem %s925_s5, 128  ;;  %p1428_p1 = scmp.lt.s32.totalorder %s925_s5, %s925_s5 }
 0x4fe   :  { %p1424_p0 = scmp.ne.s32.totalorder %s925_s5, %s1423_s20  ;;  %p1429_p2 = scmp.lt.s32.totalorder %s1423_s20, %s1423_s20 }
 0x500   :  { %p1430_p3 = por %p1429_p2, %p1428_p1 }
 0x502   :  { %p1431_p4 = pnand %p1430_p3, %p1424_p0 }
 0x504   :  { %1434 = shalt.err (!%p1431_p4)
}
 0x505   :  { %s1435_s11 = scalar_lea.hbm %s1917_s17, 128 }
 0x506   :  { %p1436_p5 = scmp.ne.s32.totalorder %s1917_s17, %s1435_s11  ;;  %p1439_p6 = scmp.lt.u32.totalorder %s1435_s11, %s1917_s17 }
 0x508   :  { %p1441_p7 = pnand %p1439_p6, %p1436_p5 }
 0x50a   :  { %1444 = shalt.err (!%p1441_p7)
}
 0x50b   :  { %927 = dma.vmem_to_hbm [thread:$0]  %s925_s5, 128, %s1917_s17, [#allocation13]   ;;  %v757_v55 = vld [vmem:[%s1913_s13] sm:$0x3] }
 0x50c   :  { %v762_v56 = vrot.slane %v757_v55, %v377_v5  ;;  %v766_v57 = vrot.slane %v757_v55, %v381_v7  ;;  %s1540_s29 = smov [#allocation15]  }
 0x50d   :  { %s934_s23 = sshll.u32 %s1540_s29, 4  ;;  %s935_s23 = int_to_ptr.vmem [resolvable:$true] %s934_s23 }
 0x50e   :  { %s1445_s17 = scalar_lea.vmem %s935_s23, 128  ;;  %p1450_p9 = scmp.lt.s32.totalorder %s935_s23, %s935_s23 }
 0x50f   :  { %p1446_p8 = scmp.ne.s32.totalorder %s935_s23, %s1445_s17  ;;  %p1451_p10 = scmp.lt.s32.totalorder %s1445_s17, %s1445_s17 }
 0x511   :  { %p1452_p11 = por %p1451_p10, %p1450_p9 }
 0x513   :  { %p1453_p12 = pnand %p1452_p11, %p1446_p8 }
 0x5b6   :  { %v883_v58 = vpop.f32.mrb[8].mxu1 }
 0x5b7   :  { %v884_v59 = vadd.f32 %v883_v58, %v762_v56  ;;  %v885_v60 = vpop.f32.mrb[9].mxu1 }
 0x5b8   :  { %v886_v61 = vadd.f32 %v885_v60, %v766_v57  ;;  %v887_v62 = vpop.f32.mrb[10].mxu1 }
 0x5b9   :  { %895 = vst [vmem:[#allocation15] sm:$0xff] %v884_v59  ;;  %v888_v63 = vpop.f32.mrb[11].mxu1 }
 0x5ba   :  { %v890_v1 = vmul.f32 1.442695, %v886_v61 }
 0x5bb   :  { %1456 = shalt.err (!%p1453_p12)
}
 0x5bc   :  { %s1457_s5 = scalar_lea.hbm %s1918_s18, 128 }
 0x5bd   :  { %p1458_p13 = scmp.ne.s32.totalorder %s1918_s18, %s1457_s5  ;;  %p1461_p0 = scmp.lt.u32.totalorder %s1457_s5, %s1918_s18 }
 0x5bf   :  { %p1463_p1 = pnand %p1461_p0, %p1458_p13 }
 0x5c1   :  { %1466 = shalt.err (!%p1463_p1)
}
 0x5c2   :  { %937 = dma.vmem_to_hbm [thread:$0]  %s935_s23, 128, %s1918_s18, [#allocation16]   ;;  %1267 = vpow2.f32 %v890_v1  ;;  %v892_v2 = vld [vmem:[%s1914_s14] sm:$0xff] }
 0x5c3   :  { %s1541_s16 = smov [#allocation17]   ;;  %s1542_s20 = smov [#allocation18]  }
 0x5c4   :  { %s944_s4 = sshll.u32 %s1541_s16, 4  ;;  %s954_s25 = sshll.u32 %s1542_s20, 4  ;;  %s945_s4 = int_to_ptr.vmem [resolvable:$true] %s944_s4  ;;  %s955_s25 = int_to_ptr.vmem [resolvable:$true] %s954_s25 }
 0x5c5   :  { %s1467_s3 = scalar_lea.vmem %s945_s4, 128  ;;  %p1472_p3 = scmp.lt.s32.totalorder %s945_s4, %s945_s4 }
 0x5c6   :  { %p1468_p2 = scmp.ne.s32.totalorder %s945_s4, %s1467_s3  ;;  %p1473_p4 = scmp.lt.s32.totalorder %s1467_s3, %s1467_s3 }
 0x5c8   :  { %p1474_p5 = por %p1473_p4, %p1472_p3 }
 0x5ca   :  { %p1475_p6 = pnand %p1474_p5, %p1468_p2 }
 0x5cc   :  { %v1268_v3 = vpop.eup %1267 }
 0x5cd   :  { %896 = vst [vmem:[#allocation17] sm:$0xff] %v1268_v3  ;;  %v893_v4 = vmul.f32 %v1268_v3, %v892_v2 }
 0x5ce   :  { %1478 = shalt.err (!%p1475_p6)
}
 0x5cf   :  { %s1479_s26 = scalar_lea.hbm %s1919_s19, 128 }
 0x5d0   :  { %p1480_p7 = scmp.ne.s32.totalorder %s1919_s19, %s1479_s26  ;;  %p1483_p8 = scmp.lt.u32.totalorder %s1479_s26, %s1919_s19 }
 0x5d2   :  { %p1485_p9 = pnand %p1483_p8, %p1480_p7 }
 0x5d4   :  { %1488 = shalt.err (!%p1485_p9)
}
 0x5d5   :  { %947 = dma.vmem_to_hbm [thread:$0]  %s945_s4, 128, %s1919_s19, [#allocation16]   ;;  %v894_v5 = vadd.f32 %v893_v4, %v884_v59 }
 0x5d6   :  { %s1489_s21 = scalar_lea.vmem %s955_s25, 128  ;;  %p1494_p11 = scmp.lt.s32.totalorder %s955_s25, %s955_s25 }
 0x5d7   :  { %897 = vst [vmem:[#allocation18] sm:$0xff] %v894_v5  ;;  %p1490_p10 = scmp.ne.s32.totalorder %s955_s25, %s1489_s21  ;;  %p1495_p12 = scmp.lt.s32.totalorder %s1489_s21, %s1489_s21 }
 0x5d9   :  { %p1496_p13 = por %p1495_p12, %p1494_p11 }
 0x5db   :  { %p1497_p0 = pnand %p1496_p13, %p1490_p10 }
 0x5dd   :  { %1500 = shalt.err (!%p1497_p0)
}
 0x5de   :  { %s1937_s23 = sld [smem:[#allocation32_spill]] }
 0x5e4   :  { %s1501_s17 = scalar_lea.hbm %s1937_s23, 128 }
 0x5e5   :  { %p1502_p1 = scmp.ne.s32.totalorder %s1937_s23, %s1501_s17  ;;  %p1505_p2 = scmp.lt.u32.totalorder %s1501_s17, %s1937_s23 }
 0x5e7   :  { %p1507_p3 = pnand %p1505_p2, %p1502_p1 }
 0x5e9   :  { %1510 = shalt.err (!%p1507_p3)
}
 0x5ea   :  { %957 = dma.vmem_to_hbm [thread:$0]  %s955_s25, 128, %s1937_s23, [#allocation19]  }
 0x5eb   :  { %1517 = dma.done.wait [#allocation4], 128  }
 0x5ec   :  { %1518 = vsyncadd [#allocation4], 4294967168 }
 0x5ed   :  { %1519 = dma.done.wait [#allocation13], 256  }
 0x5ee   :  { %1520 = vsyncadd [#allocation13], 4294967040 }
 0x5ef   :  { %1521 = dma.done.wait [#allocation16], 256  }
 0x5f0   :  { %1522 = vsyncadd [#allocation16], 4294967040 }
 0x5f1   :  { %1523 = dma.done.wait [#allocation19], 128  }
 0x5f2   :  { %1524 = vsyncadd [#allocation19], 4294967168 }
 0x5f3   :  { %976 = vsyncpa [#allocation3], 1 }
 0x5f4   :  { %977 = vsyncpa [#allocation6], 1 }
 0x5f5   :  { %978 = vsyncpa [#allocation9], 1 }
 0x5f6   :  { %979 = vsyncpa [#allocation4], 1 }
 0x5f7   :  { %980 = vsyncpa [#allocation13], 1 }
 0x5f8   :  { %981 = vsyncpa [#allocation16], 1 }
 0x5f9   :  { %982 = vsyncpa [#allocation19], 1 }

</bundles_post_ra>
